<compile_context>
chip_gen: v7x
topology: tpu7x:2x2x1
jax: 0.10.0
libtpu: 0.0.40
codegen_flags: <defaults>
</compile_context>

<pallas_src>
import functools

import jax
import jax.numpy as jnp
import numpy as np
from jax import lax
from jax.experimental import pallas as pl
from jax.experimental.pallas import tpu as pltpu


# ----------------------------------------------------------------------------
# Small helpers
# ----------------------------------------------------------------------------
_VMEM_LIMIT = 32 * 1024 * 1024  # safe on v5e/v6e (128 MiB) and v7x (64 MiB)


def _pick_tile(dim, candidates):
    """Largest candidate tile that divides `dim`, else the full dim (always legal)."""
    for c in candidates:
        if dim % c == 0:
            return c
    return dim


def _time_block(T):
    for c in (8, 4, 2):
        if T % c == 0:
            return c
    return T


def _batch_block(B_pad):
    # Split batch across the two v7x TensorCores when it is big enough to keep
    # each block sublane-aligned (multiple of 8). Harmless on v5e/v6e.
    if B_pad >= 16 and (B_pad // 2) % 8 == 0:
        return B_pad // 2
    return B_pad


_SINGLE_BUFFER_OK = None


def _single_buffer_supported():
    """Probe whether pipeline_mode=pl.Buffered(1) is accepted by this JAX/Mosaic."""
    global _SINGLE_BUFFER_OK
    if _SINGLE_BUFFER_OK is None:
        try:
            def k(x_ref, o_ref):
                o_ref[...] = x_ref[...] * 2.0

            x = jnp.ones((8, 128), jnp.float32)
            out = pl.pallas_call(
                k,
                out_shape=jax.ShapeDtypeStruct((8, 128), jnp.float32),
                grid=(2,),
                in_specs=[pl.BlockSpec((8, 128), lambda i: (0, 0),
                                       pipeline_mode=pl.Buffered(1))],
                out_specs=pl.BlockSpec((8, 128), lambda i: (0, 0)),
            )(x)
            jax.block_until_ready(out)
            _SINGLE_BUFFER_OK = True
        except Exception:
            _SINGLE_BUFFER_OK = False
    return _SINGLE_BUFFER_OK


def _invariant_spec(block_shape, index_map):
    """BlockSpec for grid-invariant operands: single-buffered when supported."""
    if _single_buffer_supported():
        return pl.BlockSpec(block_shape, index_map, pipeline_mode=pl.Buffered(1))
    return pl.BlockSpec(block_shape, index_map)


# ----------------------------------------------------------------------------
# Tiled matmul + bias kernel (used for the hoisted input projection and the
# final nn.Linear).  grid = (N/tm, V/tn, K/tk), f32 accumulator in VMEM.
# ----------------------------------------------------------------------------
def _matmul_bias_kernel(x_ref, w_ref, b_ref, o_ref, acc_ref):
    k = pl.program_id(2)

    @pl.when(k == 0)
    def _():
        acc_ref[...] = jnp.zeros_like(acc_ref)

    acc_ref[...] += jnp.dot(x_ref[...], w_ref[...],
                            preferred_element_type=jnp.float32)

    @pl.when(k == pl.num_programs(2) - 1)
    def _():
        o_ref[...] = (acc_ref[...] + b_ref[...]).astype(o_ref.dtype)


def matmul_bias(x, w_t, b, out_dtype=jnp.float32):
    """x: (N, K) bf16, w_t: (K, V) bf16 (pre-transposed), b: (1, V) f32."""
    N, K = x.shape
    V = w_t.shape[-1]
    tm = _pick_tile(N, (512, 256, 128))
    tn = _pick_tile(V, (1024, 512, 256, 128))
    tk = _pick_tile(K, (512, 256, 128))
    grid = (N // tm, V // tn, K // tk)
    return pl.pallas_call(
        _matmul_bias_kernel,
        out_shape=jax.ShapeDtypeStruct((N, V), out_dtype),
        grid_spec=pltpu.PrefetchScalarGridSpec(
            num_scalar_prefetch=0,
            grid=grid,
            in_specs=[
                pl.BlockSpec((tm, tk), lambda i, j, k: (i, k)),
                pl.BlockSpec((tk, tn), lambda i, j, k: (k, j)),
                pl.BlockSpec((1, tn), lambda i, j, k: (0, j)),
            ],
            out_specs=pl.BlockSpec((tm, tn), lambda i, j, k: (i, j)),
            scratch_shapes=[pltpu.VMEM((tm, tn), jnp.float32)],
        ),
        compiler_params=pltpu.CompilerParams(
            dimension_semantics=("parallel", "parallel", "arbitrary"),
            vmem_limit_bytes=_VMEM_LIMIT),
    )(x, w_t, b)


# ----------------------------------------------------------------------------
# GRU recurrence kernel.
#   grid = (B_pad/b_blk [parallel], T/t_blk [arbitrary]); the hidden state is
#   carried across time blocks in an f32 VMEM scratch.
#   gi already contains x@W_ih^T + b_ih with b_hh's r/z parts folded in; the
#   n-gate's b_hh_n is added inside (it is scaled by r).  PyTorch gate order
#   along the 3H axis is [r, z, n].
# ----------------------------------------------------------------------------
def _gru_rnn_kernel(gi_ref, h0_ref, w_hh_ref, b_hhn_ref, y_ref, hT_ref,
                    h_scratch):
    t = pl.program_id(1)
    n_t = pl.num_programs(1)
    Bb, H = h_scratch.shape
    t_blk = gi_ref.shape[0]

    @pl.when(t == 0)
    def _():
        h_scratch[...] = h0_ref[...].astype(jnp.float32)

    w_hh = w_hh_ref[...]                                           # (H, 3H) bf16
    # hoist the bias broadcast out of the unrolled loop (not CSE'd otherwise)
    b_hh_n = jnp.broadcast_to(b_hhn_ref[...], (Bb, H)).astype(jnp.float32)

    def step(i, carry):
        h_prev = h_scratch[...]                                    # (Bb, H) f32
        gi = gi_ref[i]                                             # (Bb, 3H) f32
        gh = jnp.dot(h_prev.astype(w_hh.dtype), w_hh,
                     preferred_element_type=jnp.float32)           # (Bb, 3H) f32
        r = jax.nn.sigmoid(gi[:, :H] + gh[:, :H])
        z = jax.nn.sigmoid(gi[:, H:2 * H] + gh[:, H:2 * H])
        n = jnp.tanh(gi[:, 2 * H:] + r * (gh[:, 2 * H:] + b_hh_n))
        h_new = (1.0 - z) * n + z * h_prev
        h_scratch[...] = h_new
        y_ref[i] = h_new.astype(y_ref.dtype)
        return carry

    lax.fori_loop(0, t_blk, step, 0, unroll=True)

    # write the final hidden state once, on the last time block only
    @pl.when(t == n_t - 1)
    def _():
        hT_ref[...] = h_scratch[...].astype(hT_ref.dtype)


def gru_recurrence(gi, h0, w_hh_t, b_hh_n):
    """gi: (T, B_pad, 3H) f32, h0: (B_pad, H) f32, w_hh_t: (H, 3H) bf16,
    b_hh_n: (1, H) f32.  Returns y (T, B_pad, H) bf16 and hT (B_pad, H) f32."""
    T, B_pad, H3 = gi.shape
    H = h0.shape[-1]
    t_blk = _time_block(T)
    b_blk = _batch_block(B_pad)
    grid = (B_pad // b_blk, T // t_blk)

    y, hT = pl.pallas_call(
        _gru_rnn_kernel,
        out_shape=(jax.ShapeDtypeStruct((T, B_pad, H), jnp.bfloat16),
                   jax.ShapeDtypeStruct((B_pad, H), jnp.float32)),
        grid_spec=pltpu.PrefetchScalarGridSpec(
            num_scalar_prefetch=0,
            grid=grid,
            in_specs=[
                pl.BlockSpec((t_blk, b_blk, 3 * H), lambda b, t: (t, b, 0)),
                pl.BlockSpec((b_blk, H), lambda b, t: (b, 0)),          # h0
                _invariant_spec((H, 3 * H), lambda b, t: (0, 0)),       # W_hh^T
                _invariant_spec((1, H), lambda b, t: (0, 0)),           # b_hh_n
            ],
            out_specs=(
                pl.BlockSpec((t_blk, b_blk, H), lambda b, t: (t, b, 0)),  # y
                pl.BlockSpec((b_blk, H), lambda b, t: (b, 0)),            # hT
            ),
            scratch_shapes=[pltpu.VMEM((b_blk, H), jnp.float32)],
        ),
        compiler_params=pltpu.CompilerParams(
            dimension_semantics=("parallel", "arbitrary"),
            vmem_limit_bytes=_VMEM_LIMIT),
    )(gi, h0, w_hh_t, b_hh_n)
    return y, hT


# ----------------------------------------------------------------------------
# Full GeneralGRU forward.
# ----------------------------------------------------------------------------
def general_gru_forward(params, tokens, initial_hidden, ff=True,
                        contains_extra_input_data=False, extra_input_data=None):
    B, T = tokens.shape
    H = params["gru_layers"][0]["w_hh_t"].shape[0]

    # Embedding lookup (gather) stays in plain JAX glue.
    embedded = jnp.take(params["embedding"], tokens, axis=0)        # (B, T, E)
    if contains_extra_input_data:
        embedded = jnp.concatenate([embedded, extra_input_data], axis=2)

    x = jnp.transpose(embedded, (1, 0, 2)).astype(jnp.bfloat16)     # (T, B, E)

    # Pad batch to a sublane multiple (8); sliced back at the end.
    B_pad = ((B + 7) // 8) * 8
    if B_pad != B:
        x = jnp.pad(x, ((0, 0), (0, B_pad - B), (0, 0)))
        h0_all = jnp.pad(initial_hidden, ((0, 0), (0, B_pad - B), (0, 0)))
    else:
        h0_all = initial_hidden

    finals = []
    for li, lp in enumerate(params["gru_layers"]):
        Tc, Bp, E = x.shape
        b_ih, b_hh = lp["b_ih"], lp["b_hh"]
        # Fold the r/z halves of b_hh into the input-projection bias; the
        # n-gate's b_hh must stay separate (it is scaled by r).
        b_fused = jnp.concatenate(
            [b_ih[:, :2 * H] + b_hh[:, :2 * H], b_ih[:, 2 * H:]], axis=-1)
        b_hh_n = b_hh[:, 2 * H:]

        # Hoisted input projection: one big MXU matmul over the whole sequence.
        gi = matmul_bias(x.reshape(Tc * Bp, E), lp["w_ih_t"], b_fused,
                         out_dtype=jnp.float32).reshape(Tc, Bp, 3 * H)

        y, hT = gru_recurrence(gi, h0_all[li].astype(jnp.float32),
                               lp["w_hh_t"], b_hh_n)
        finals.append(hT)
        x = y                                                       # (T, Bp, H) bf16

    outputs_p = jnp.transpose(x, (1, 0, 2))                         # (Bp, T, H) bf16
    hidden = jnp.stack(finals, axis=0)[:, :B]                       # (L, B, H) f32

    if ff:
        Bp = outputs_p.shape[0]
        flat = outputs_p.reshape(Bp * T, H)
        logits = matmul_bias(flat, params["ff_w_t"], params["ff_b"],
                             out_dtype=jnp.float32)
        return logits.reshape(Bp, T, -1)[:B], hidden                # (B, T, V)
    return outputs_p[:B].astype(jnp.float32), hidden


# ----------------------------------------------------------------------------
# Pure-JAX reference with the same numerics (bf16 matmul operands, f32 accum).
# ----------------------------------------------------------------------------
def general_gru_ref(params, tokens, initial_hidden, ff=True):
    H = params["gru_layers"][0]["w_hh_t"].shape[0]
    emb = jnp.take(params["embedding"], tokens, axis=0)
    x = jnp.transpose(emb, (1, 0, 2)).astype(jnp.bfloat16)          # (T, B, E)
    finals = []
    for li, lp in enumerate(params["gru_layers"]):
        def step(h, x_t, lp=lp):
            gi = jnp.dot(x_t, lp["w_ih_t"],
                         preferred_element_type=jnp.float32) + lp["b_ih"]
            gh = jnp.dot(h.astype(jnp.bfloat16), lp["w_hh_t"],
                         preferred_element_type=jnp.float32) + lp["b_hh"]
            r = jax.nn.sigmoid(gi[:, :H] + gh[:, :H])
            z = jax.nn.sigmoid(gi[:, H:2 * H] + gh[:, H:2 * H])
            n = jnp.tanh(gi[:, 2 * H:] + r * gh[:, 2 * H:])
            h_new = (1.0 - z) * n + z * h
            return h_new, h_new.astype(jnp.bfloat16)

        hT, ys = lax.scan(step, initial_hidden[li], x)
        finals.append(hT)
        x = ys
    outputs = jnp.transpose(x, (1, 0, 2))                           # (B, T, H) bf16
    hidden = jnp.stack(finals, axis=0)
    if ff:
        logits = jnp.dot(outputs, params["ff_w_t"],
                         preferred_element_type=jnp.float32) + params["ff_b"]
        return logits, hidden
    return outputs.astype(jnp.float32), hidden


# ----------------------------------------------------------------------------
# Deterministic parameter init (PyTorch-style U(-1/sqrt(H), 1/sqrt(H))).
# Weights stored pre-transposed, in bf16 for the MXU; biases/embedding in f32.
# ----------------------------------------------------------------------------
def init_params(key, vocab_size, embedding_size, input_size, hidden_size,
                n_layers):
    keys = jax.random.split(key, 3 + 4 * n_layers)
    k = 1.0 / np.sqrt(hidden_size)

    def uni(kk, shape, dtype=jnp.float32):
        return jax.random.uniform(kk, shape, jnp.float32, -k, k).astype(dtype)

    params = {
        "embedding": jax.random.normal(
            keys[0], (vocab_size, embedding_size), jnp.float32),
        "ff_w_t": uni(keys[1], (hidden_size, vocab_size), jnp.bfloat16),
        "ff_b": uni(keys[2], (1, vocab_size)),
        "gru_layers": [],
    }
    for layer in range(n_layers):
        in_sz = input_size if layer == 0 else hidden_size
        kk = keys[3 + 4 * layer: 7 + 4 * layer]
        params["gru_layers"].append({
            # pre-transposed (in, 3H), gate order [r, z, n]
            "w_ih_t": uni(kk[0], (in_sz, 3 * hidden_size), jnp.bfloat16),
            "w_hh_t": uni(kk[1], (hidden_size, 3 * hidden_size), jnp.bfloat16),
            "b_ih": uni(kk[2], (1, 3 * hidden_size)),
            "b_hh": uni(kk[3], (1, 3 * hidden_size)),
        })
    return params


if __name__ == "__main__":
    # Small, self-consistent shapes (input_size == embedding_size, as the module
    # requires when contains_extra_input_data=False).  H is a lane multiple so
    # gate slices are lane-dense; the tiny batch is padded to 8 internally.
    vocab_size = 256
    embedding_size = 128
    input_size = 128
    hidden_size = 128
    n_layers = 2
    batch = 2
    seq = 16

    key = jax.random.PRNGKey(0)
    pkey, tkey, hkey = jax.random.split(key, 3)

    params = init_params(pkey, vocab_size, embedding_size, input_size,
                         hidden_size, n_layers)
    tokens = jax.random.randint(tkey, (batch, seq), 0, vocab_size, jnp.int32)
    initial_hidden = jax.random.normal(
        hkey, (n_layers, batch, hidden_size), jnp.float32)

    _single_buffer_supported()   # run the Buffered(1) probe once, outside jit

    fwd = jax.jit(functools.partial(general_gru_forward, ff=True))
    logits, hidden = fwd(params, tokens, initial_hidden)
    jax.block_until_ready((logits, hidden))

    assert logits.shape == (batch, seq, vocab_size)
    assert hidden.shape == (n_layers, batch, hidden_size)

    ref_logits, ref_hidden = general_gru_ref(params, tokens, initial_hidden)
    np.testing.assert_allclose(np.asarray(logits), np.asarray(ref_logits),
                               rtol=5e-3, atol=5e-3)
    np.testing.assert_allclose(np.asarray(hidden), np.asarray(ref_hidden),
                               rtol=5e-3, atol=5e-3)

    print("KERNEL_OK")
</pallas_src>

<mosaic_0001>
module attributes {stable_mosaic.version = 11 : i64} {
  func.func @k(%arg0: i32, %arg1: memref<8x128xf32, #tpu.memory_space<vmem>>, %arg2: memref<8x128xf32, #tpu.memory_space<vmem>>) attributes {dimension_semantics = [#tpu.dimension_semantics<arbitrary>], iteration_bounds = array<i64: 2>, scalar_prefetch = 0 : i64, scratch_operands = 0 : i64, tpu.core_type = #tpu.core_type<tc>, window_params = [{pipeline_mode = #tpu.pipeline_mode<synchronous>, transform_indices = @transform_0, window_bounds = array<i64: 8, 128>}, {pipeline_mode = #tpu.pipeline_mode<synchronous>, transform_indices = @transform_1, window_bounds = array<i64: 8, 128>}]} {
    %c0 = arith.constant 0 : index
    %c0_0 = arith.constant 0 : index
    %0 = vector.load %arg1[%c0, %c0_0] : memref<8x128xf32, #tpu.memory_space<vmem>>, vector<8x128xf32>
    %cst = arith.constant 2.000000e+00 : f32
    %1 = vector.broadcast %cst : f32 to vector<8x128xf32>
    %2 = arith.mulf %0, %1 : vector<8x128xf32>
    %c0_1 = arith.constant 0 : index
    %c0_2 = arith.constant 0 : index
    %3 = vector.load %arg2[%c0_1, %c0_2] : memref<8x128xf32, #tpu.memory_space<vmem>>, vector<8x128xf32>
    tpu.vector_store %arg2[%c0_1, %c0_2], %2 {strides = array<i32>} : memref<8x128xf32, #tpu.memory_space<vmem>>, vector<8x128xf32>,
    return
  }
  func.func @transform_0(%arg0: i32) -> (i32, i32) {
    %c0_i32 = arith.constant 0 : i32
    %c0_i32_0 = arith.constant 0 : i32
    %c0_i32_1 = arith.constant 0 : i32
    return %c0_i32, %c0_i32_0 : i32, i32
  }
  func.func @transform_1(%arg0: i32) -> (i32, i32) {
    %c0_i32 = arith.constant 0 : i32
    %c0_i32_0 = arith.constant 0 : i32
    %c0_i32_1 = arith.constant 0 : i32
    return %c0_i32, %c0_i32_0 : i32, i32
  }
}

module attributes {stable_mosaic.version = 11 : i64} {
  func.func @_matmul_bias_kernel(%arg0: i32, %arg1: i32, %arg2: i32, %arg3: memref<128x128xbf16, #tpu.memory_space<vmem>>, %arg4: memref<128x128xbf16, #tpu.memory_space<vmem>>, %arg5: memref<1x128xf32, #tpu.memory_space<vmem>>, %arg6: memref<128x128xf32, #tpu.memory_space<vmem>>, %arg7: memref<128x128xf32, #tpu.memory_space<vmem>>) attributes {dimension_semantics = [#tpu.dimension_semantics<parallel>, #tpu.dimension_semantics<parallel>, #tpu.dimension_semantics<arbitrary>], iteration_bounds = array<i64: 1, 3, 1>, scalar_prefetch = 0 : i64, scratch_operands = 1 : i64, tpu.core_type = #tpu.core_type<tc>, window_params = [{transform_indices = @transform_0, window_bounds = array<i64: 128, 128>}, {transform_indices = @transform_1, window_bounds = array<i64: 128, 128>}, {transform_indices = @transform_2, window_bounds = array<i64: 1, 128>}, {transform_indices = @transform_3, window_bounds = array<i64: 128, 128>}]} {
    %c0_i32 = arith.constant 0 : i32
    %0 = arith.cmpi eq, %arg2, %c0_i32 : i32
    %1 = arith.extui %0 : i1 to i32
    %c0_i32_0 = arith.constant 0 : i32
    %2 = arith.cmpi ne, %1, %c0_i32_0 : i32
    scf.if %2 {
      %cst_10 = arith.constant 0.000000e+00 : f32
      %12 = vector.broadcast %cst_10 : f32 to vector<128x128xf32>
      %c0_11 = arith.constant 0 : index
      %c0_12 = arith.constant 0 : index
      %13 = vector.load %arg7[%c0_11, %c0_12] : memref<128x128xf32, #tpu.memory_space<vmem>>, vector<128x128xf32>
      tpu.vector_store %arg7[%c0_11, %c0_12], %12 {strides = array<i32>} : memref<128x128xf32, #tpu.memory_space<vmem>>, vector<128x128xf32>,
    } else {
    }
    %c0 = arith.constant 0 : index
    %c0_1 = arith.constant 0 : index
    %3 = vector.load %arg7[%c0, %c0_1] : memref<128x128xf32, #tpu.memory_space<vmem>>, vector<128x128xf32>
    %c0_2 = arith.constant 0 : index
    %c0_3 = arith.constant 0 : index
    %4 = vector.load %arg3[%c0_2, %c0_3] : memref<128x128xbf16, #tpu.memory_space<vmem>>, vector<128x128xbf16>
    %c0_4 = arith.constant 0 : index
    %c0_5 = arith.constant 0 : index
    %5 = vector.load %arg4[%c0_4, %c0_5] : memref<128x128xbf16, #tpu.memory_space<vmem>>, vector<128x128xbf16>
    %cst = arith.constant dense<0.000000e+00> : vector<128x128xf32>
    %6 = tpu.matmul %4, %5, %cst {dimension_numbers = #tpu.dot_dimension_numbers<[1], [0], [0], [1], [0, 0, 1, 1], [], []>} : vector<128x128xbf16>, vector<128x128xbf16>, vector<128x128xf32> -> vector<128x128xf32>
    %7 = arith.addf %3, %6 : vector<128x128xf32>
    %c0_6 = arith.constant 0 : index
    %c0_7 = arith.constant 0 : index
    %8 = vector.load %arg7[%c0_6, %c0_7] : memref<128x128xf32, #tpu.memory_space<vmem>>, vector<128x128xf32>
    tpu.vector_store %arg7[%c0_6, %c0_7], %7 {strides = array<i32>} : memref<128x128xf32, #tpu.memory_space<vmem>>, vector<128x128xf32>,
    %c0_i32_8 = arith.constant 0 : i32
    %9 = arith.cmpi eq, %arg2, %c0_i32_8 : i32
    %10 = arith.extui %9 : i1 to i32
    %c0_i32_9 = arith.constant 0 : i32
    %11 = arith.cmpi ne, %10, %c0_i32_9 : i32
    scf.if %11 {
      %c0_10 = arith.constant 0 : index
      %c0_11 = arith.constant 0 : index
      %12 = vector.load %arg7[%c0_10, %c0_11] : memref<128x128xf32, #tpu.memory_space<vmem>>, vector<128x128xf32>
      %c0_12 = arith.constant 0 : index
      %c0_13 = arith.constant 0 : index
      %13 = vector.load %arg5[%c0_12, %c0_13] : memref<1x128xf32, #tpu.memory_space<vmem>>, vector<1x128xf32>
      %14 = vector.broadcast %13 : vector<1x128xf32> to vector<128x128xf32>
      %15 = arith.addf %12, %14 : vector<128x128xf32>
      %c0_14 = arith.constant 0 : index
      %c0_15 = arith.constant 0 : index
      %16 = vector.load %arg6[%c0_14, %c0_15] : memref<128x128xf32, #tpu.memory_space<vmem>>, vector<128x128xf32>
      tpu.vector_store %arg6[%c0_14, %c0_15], %15 {strides = array<i32>} : memref<128x128xf32, #tpu.memory_space<vmem>>, vector<128x128xf32>,
    } else {
    }
    return
  }
  func.func @transform_0(%arg0: i32, %arg1: i32, %arg2: i32) -> (i32, i32) {
    %c0_i32 = arith.constant 0 : i32
    return %arg0, %arg2 : i32, i32
  }
  func.func @transform_1(%arg0: i32, %arg1: i32, %arg2: i32) -> (i32, i32) {
    %c0_i32 = arith.constant 0 : i32
    return %arg2, %arg1 : i32, i32
  }
  func.func @transform_2(%arg0: i32, %arg1: i32, %arg2: i32) -> (i32, i32) {
    %c0_i32 = arith.constant 0 : i32
    %c0_i32_0 = arith.constant 0 : i32
    return %c0_i32, %arg1 : i32, i32
  }
  func.func @transform_3(%arg0: i32, %arg1: i32, %arg2: i32) -> (i32, i32) {
    %c0_i32 = arith.constant 0 : i32
    return %arg0, %arg1 : i32, i32
  }
}

module attributes {stable_mosaic.version = 11 : i64} {
  func.func @_gru_rnn_kernel(%arg0: i32, %arg1: i32, %arg2: memref<8x8x384xf32, #tpu.memory_space<vmem>>, %arg3: memref<8x128xf32, #tpu.memory_space<vmem>>, %arg4: memref<128x384xbf16, #tpu.memory_space<vmem>>, %arg5: memref<1x128xf32, #tpu.memory_space<vmem>>, %arg6: memref<8x8x128xbf16, #tpu.memory_space<vmem>>, %arg7: memref<8x128xf32, #tpu.memory_space<vmem>>, %arg8: memref<8x128xf32, #tpu.memory_space<vmem>>) attributes {dimension_semantics = [#tpu.dimension_semantics<parallel>, #tpu.dimension_semantics<arbitrary>], iteration_bounds = array<i64: 1, 2>, scalar_prefetch = 0 : i64, scratch_operands = 1 : i64, tpu.core_type = #tpu.core_type<tc>, window_params = [{transform_indices = @transform_0, window_bounds = array<i64: 8, 8, 384>}, {transform_indices = @transform_1, window_bounds = array<i64: 8, 128>}, {pipeline_mode = #tpu.pipeline_mode<synchronous>, transform_indices = @transform_2, window_bounds = array<i64: 128, 384>}, {pipeline_mode = #tpu.pipeline_mode<synchronous>, transform_indices = @transform_3, window_bounds = array<i64: 1, 128>}, {transform_indices = @transform_4, window_bounds = array<i64: 8, 8, 128>}, {transform_indices = @transform_5, window_bounds = array<i64: 8, 128>}]} {
    %c0_i32 = arith.constant 0 : i32
    %0 = arith.cmpi eq, %arg1, %c0_i32 : i32
    %1 = arith.extui %0 : i1 to i32
    %c0_i32_0 = arith.constant 0 : i32
    %2 = arith.cmpi ne, %1, %c0_i32_0 : i32
    scf.if %2 {
      %c0_102 = arith.constant 0 : index
      %c0_103 = arith.constant 0 : index
      %322 = vector.load %arg3[%c0_102, %c0_103] : memref<8x128xf32, #tpu.memory_space<vmem>>, vector<8x128xf32>
      %c0_104 = arith.constant 0 : index
      %c0_105 = arith.constant 0 : index
      %323 = vector.load %arg8[%c0_104, %c0_105] : memref<8x128xf32, #tpu.memory_space<vmem>>, vector<8x128xf32>
      tpu.vector_store %arg8[%c0_104, %c0_105], %322 {strides = array<i32>} : memref<8x128xf32, #tpu.memory_space<vmem>>, vector<8x128xf32>,
    } else {
    }
    %c0 = arith.constant 0 : index
    %c0_1 = arith.constant 0 : index
    %3 = vector.load %arg4[%c0, %c0_1] : memref<128x384xbf16, #tpu.memory_space<vmem>>, vector<128x384xbf16>
    %c0_2 = arith.constant 0 : index
    %c0_3 = arith.constant 0 : index
    %4 = vector.load %arg5[%c0_2, %c0_3] : memref<1x128xf32, #tpu.memory_space<vmem>>, vector<1x128xf32>
    %5 = vector.shape_cast %4 : vector<1x128xf32> to vector<1x128xf32>
    %6 = vector.broadcast %5 : vector<1x128xf32> to vector<8x128xf32>
    %c0_i32_4 = arith.constant 0 : i32
    %c0_5 = arith.constant 0 : index
    %c0_6 = arith.constant 0 : index
    %7 = vector.load %arg8[%c0_5, %c0_6] : memref<8x128xf32, #tpu.memory_space<vmem>>, vector<8x128xf32>
    %8 = arith.index_cast %c0_i32_4 : i32 to index
    %c0_7 = arith.constant 0 : index
    %c0_8 = arith.constant 0 : index
    %9 = vector.load %arg2[%8, %c0_7, %c0_8] : memref<8x8x384xf32, #tpu.memory_space<vmem>>, vector<1x8x384xf32>
    %10 = vector.shape_cast %9 : vector<1x8x384xf32> to vector<8x384xf32>
    %11 = arith.truncf %7 : vector<8x128xf32> to vector<8x128xbf16>
    %cst = arith.constant dense<0.000000e+00> : vector<8x384xf32>
    %12 = tpu.matmul %11, %3, %cst {dimension_numbers = #tpu.dot_dimension_numbers<[1], [0], [0], [1], [0, 0, 1, 1], [], []>} : vector<8x128xbf16>, vector<128x384xbf16>, vector<8x384xf32> -> vector<8x384xf32>
    %13 = vector.extract_strided_slice %10 {offsets = [0, 0], sizes = [8, 128], strides = [1, 1]} : vector<8x384xf32> to vector<8x128xf32>
    %14 = vector.extract_strided_slice %12 {offsets = [0, 0], sizes = [8, 128], strides = [1, 1]} : vector<8x384xf32> to vector<8x128xf32>
    %15 = arith.addf %13, %14 : vector<8x128xf32>
    %16 = arith.negf %15 : vector<8x128xf32>
    %17 = math.exp %16 : vector<8x128xf32>
    %cst_9 = arith.constant 1.000000e+00 : f32
    %18 = vector.broadcast %cst_9 : f32 to vector<8x128xf32>
    %19 = arith.addf %18, %17 : vector<8x128xf32>
    %20 = arith.divf %18, %19 : vector<8x128xf32>
    %21 = vector.extract_strided_slice %10 {offsets = [0, 128], sizes = [8, 128], strides = [1, 1]} : vector<8x384xf32> to vector<8x128xf32>
    %22 = vector.extract_strided_slice %12 {offsets = [0, 128], sizes = [8, 128], strides = [1, 1]} : vector<8x384xf32> to vector<8x128xf32>
    %23 = arith.addf %21, %22 : vector<8x128xf32>
    %24 = arith.negf %23 : vector<8x128xf32>
    %25 = math.exp %24 : vector<8x128xf32>
    %cst_10 = arith.constant 1.000000e+00 : f32
    %26 = vector.broadcast %cst_10 : f32 to vector<8x128xf32>
    %27 = arith.addf %26, %25 : vector<8x128xf32>
    %28 = arith.divf %26, %27 : vector<8x128xf32>
    %29 = vector.extract_strided_slice %10 {offsets = [0, 256], sizes = [8, 128], strides = [1, 1]} : vector<8x384xf32> to vector<8x128xf32>
    %30 = vector.extract_strided_slice %12 {offsets = [0, 256], sizes = [8, 128], strides = [1, 1]} : vector<8x384xf32> to vector<8x128xf32>
    %31 = arith.addf %30, %6 : vector<8x128xf32>
    %32 = arith.mulf %20, %31 : vector<8x128xf32>
    %33 = arith.addf %29, %32 : vector<8x128xf32>
    %34 = math.tanh %33 : vector<8x128xf32>
    %cst_11 = arith.constant 1.000000e+00 : f32
    %35 = vector.broadcast %cst_11 : f32 to vector<8x128xf32>
    %36 = arith.subf %35, %28 : vector<8x128xf32>
    %37 = arith.mulf %36, %34 : vector<8x128xf32>
    %38 = arith.mulf %28, %7 : vector<8x128xf32>
    %39 = arith.addf %37, %38 : vector<8x128xf32>
    %c0_12 = arith.constant 0 : index
    %c0_13 = arith.constant 0 : index
    %40 = vector.load %arg8[%c0_12, %c0_13] : memref<8x128xf32, #tpu.memory_space<vmem>>, vector<8x128xf32>
    tpu.vector_store %arg8[%c0_12, %c0_13], %39 {strides = array<i32>} : memref<8x128xf32, #tpu.memory_space<vmem>>, vector<8x128xf32>,
    %41 = arith.truncf %39 : vector<8x128xf32> to vector<8x128xbf16>
    %42 = arith.index_cast %c0_i32_4 : i32 to index
    %c0_14 = arith.constant 0 : index
    %c0_15 = arith.constant 0 : index
    %43 = vector.load %arg6[%42, %c0_14, %c0_15] : memref<8x8x128xbf16, #tpu.memory_space<vmem>>, vector<1x8x128xbf16>
    %44 = vector.shape_cast %43 : vector<1x8x128xbf16> to vector<8x128xbf16>
    %45 = vector.shape_cast %41 : vector<8x128xbf16> to vector<1x8x128xbf16>
    tpu.vector_store %arg6[%42, %c0_14, %c0_15], %45 {strides = array<i32>} : memref<8x8x128xbf16, #tpu.memory_space<vmem>>, vector<1x8x128xbf16>,
    %c1_i32 = arith.constant 1 : i32
    %c0_16 = arith.constant 0 : index
    %c0_17 = arith.constant 0 : index
    %46 = vector.load %arg8[%c0_16, %c0_17] : memref<8x128xf32, #tpu.memory_space<vmem>>, vector<8x128xf32>
    %47 = arith.index_cast %c1_i32 : i32 to index
    %c0_18 = arith.constant 0 : index
    %c0_19 = arith.constant 0 : index
    %48 = vector.load %arg2[%47, %c0_18, %c0_19] : memref<8x8x384xf32, #tpu.memory_space<vmem>>, vector<1x8x384xf32>
    %49 = vector.shape_cast %48 : vector<1x8x384xf32> to vector<8x384xf32>
    %50 = arith.truncf %46 : vector<8x128xf32> to vector<8x128xbf16>
    %cst_20 = arith.constant dense<0.000000e+00> : vector<8x384xf32>
    %51 = tpu.matmul %50, %3, %cst_20 {dimension_numbers = #tpu.dot_dimension_numbers<[1], [0], [0], [1], [0, 0, 1, 1], [], []>} : vector<8x128xbf16>, vector<128x384xbf16>, vector<8x384xf32> -> vector<8x384xf32>
    %52 = vector.extract_strided_slice %49 {offsets = [0, 0], sizes = [8, 128], strides = [1, 1]} : vector<8x384xf32> to vector<8x128xf32>
    %53 = vector.extract_strided_slice %51 {offsets = [0, 0], sizes = [8, 128], strides = [1, 1]} : vector<8x384xf32> to vector<8x128xf32>
    %54 = arith.addf %52, %53 : vector<8x128xf32>
    %55 = arith.negf %54 : vector<8x128xf32>
    %56 = math.exp %55 : vector<8x128xf32>
    %cst_21 = arith.constant 1.000000e+00 : f32
    %57 = vector.broadcast %cst_21 : f32 to vector<8x128xf32>
    %58 = arith.addf %57, %56 : vector<8x128xf32>
    %59 = arith.divf %57, %58 : vector<8x128xf32>
    %60 = vector.extract_strided_slice %49 {offsets = [0, 128], sizes = [8, 128], strides = [1, 1]} : vector<8x384xf32> to vector<8x128xf32>
    %61 = vector.extract_strided_slice %51 {offsets = [0, 128], sizes = [8, 128], strides = [1, 1]} : vector<8x384xf32> to vector<8x128xf32>
    %62 = arith.addf %60, %61 : vector<8x128xf32>
    %63 = arith.negf %62 : vector<8x128xf32>
    %64 = math.exp %63 : vector<8x128xf32>
    %cst_22 = arith.constant 1.000000e+00 : f32
    %65 = vector.broadcast %cst_22 : f32 to vector<8x128xf32>
    %66 = arith.addf %65, %64 : vector<8x128xf32>
    %67 = arith.divf %65, %66 : vector<8x128xf32>
    %68 = vector.extract_strided_slice %49 {offsets = [0, 256], sizes = [8, 128], strides = [1, 1]} : vector<8x384xf32> to vector<8x128xf32>
    %69 = vector.extract_strided_slice %51 {offsets = [0, 256], sizes = [8, 128], strides = [1, 1]} : vector<8x384xf32> to vector<8x128xf32>
    %70 = arith.addf %69, %6 : vector<8x128xf32>
    %71 = arith.mulf %59, %70 : vector<8x128xf32>
    %72 = arith.addf %68, %71 : vector<8x128xf32>
    %73 = math.tanh %72 : vector<8x128xf32>
    %cst_23 = arith.constant 1.000000e+00 : f32
    %74 = vector.broadcast %cst_23 : f32 to vector<8x128xf32>
    %75 = arith.subf %74, %67 : vector<8x128xf32>
    %76 = arith.mulf %75, %73 : vector<8x128xf32>
    %77 = arith.mulf %67, %46 : vector<8x128xf32>
    %78 = arith.addf %76, %77 : vector<8x128xf32>
    %c0_24 = arith.constant 0 : index
    %c0_25 = arith.constant 0 : index
    %79 = vector.load %arg8[%c0_24, %c0_25] : memref<8x128xf32, #tpu.memory_space<vmem>>, vector<8x128xf32>
    tpu.vector_store %arg8[%c0_24, %c0_25], %78 {strides = array<i32>} : memref<8x128xf32, #tpu.memory_space<vmem>>, vector<8x128xf32>,
    %80 = arith.truncf %78 : vector<8x128xf32> to vector<8x128xbf16>
    %81 = arith.index_cast %c1_i32 : i32 to index
    %c0_26 = arith.constant 0 : index
    %c0_27 = arith.constant 0 : index
    %82 = vector.load %arg6[%81, %c0_26, %c0_27] : memref<8x8x128xbf16, #tpu.memory_space<vmem>>, vector<1x8x128xbf16>
    %83 = vector.shape_cast %82 : vector<1x8x128xbf16> to vector<8x128xbf16>
    %84 = vector.shape_cast %80 : vector<8x128xbf16> to vector<1x8x128xbf16>
    tpu.vector_store %arg6[%81, %c0_26, %c0_27], %84 {strides = array<i32>} : memref<8x8x128xbf16, #tpu.memory_space<vmem>>, vector<1x8x128xbf16>,
    %c2_i32 = arith.constant 2 : i32
    %c0_28 = arith.constant 0 : index
    %c0_29 = arith.constant 0 : index
    %85 = vector.load %arg8[%c0_28, %c0_29] : memref<8x128xf32, #tpu.memory_space<vmem>>, vector<8x128xf32>
    %86 = arith.index_cast %c2_i32 : i32 to index
    %c0_30 = arith.constant 0 : index
    %c0_31 = arith.constant 0 : index
    %87 = vector.load %arg2[%86, %c0_30, %c0_31] : memref<8x8x384xf32, #tpu.memory_space<vmem>>, vector<1x8x384xf32>
    %88 = vector.shape_cast %87 : vector<1x8x384xf32> to vector<8x384xf32>
    %89 = arith.truncf %85 : vector<8x128xf32> to vector<8x128xbf16>
    %cst_32 = arith.constant dense<0.000000e+00> : vector<8x384xf32>
    %90 = tpu.matmul %89, %3, %cst_32 {dimension_numbers = #tpu.dot_dimension_numbers<[1], [0], [0], [1], [0, 0, 1, 1], [], []>} : vector<8x128xbf16>, vector<128x384xbf16>, vector<8x384xf32> -> vector<8x384xf32>
    %91 = vector.extract_strided_slice %88 {offsets = [0, 0], sizes = [8, 128], strides = [1, 1]} : vector<8x384xf32> to vector<8x128xf32>
    %92 = vector.extract_strided_slice %90 {offsets = [0, 0], sizes = [8, 128], strides = [1, 1]} : vector<8x384xf32> to vector<8x128xf32>
    %93 = arith.addf %91, %92 : vector<8x128xf32>
    %94 = arith.negf %93 : vector<8x128xf32>
    %95 = math.exp %94 : vector<8x128xf32>
    %cst_33 = arith.constant 1.000000e+00 : f32
    %96 = vector.broadcast %cst_33 : f32 to vector<8x128xf32>
    %97 = arith.addf %96, %95 : vector<8x128xf32>
    %98 = arith.divf %96, %97 : vector<8x128xf32>
    %99 = vector.extract_strided_slice %88 {offsets = [0, 128], sizes = [8, 128], strides = [1, 1]} : vector<8x384xf32> to vector<8x128xf32>
    %100 = vector.extract_strided_slice %90 {offsets = [0, 128], sizes = [8, 128], strides = [1, 1]} : vector<8x384xf32> to vector<8x128xf32>
    %101 = arith.addf %99, %100 : vector<8x128xf32>
    %102 = arith.negf %101 : vector<8x128xf32>
    %103 = math.exp %102 : vector<8x128xf32>
    %cst_34 = arith.constant 1.000000e+00 : f32
    %104 = vector.broadcast %cst_34 : f32 to vector<8x128xf32>
    %105 = arith.addf %104, %103 : vector<8x128xf32>
    %106 = arith.divf %104, %105 : vector<8x128xf32>
    %107 = vector.extract_strided_slice %88 {offsets = [0, 256], sizes = [8, 128], strides = [1, 1]} : vector<8x384xf32> to vector<8x128xf32>
    %108 = vector.extract_strided_slice %90 {offsets = [0, 256], sizes = [8, 128], strides = [1, 1]} : vector<8x384xf32> to vector<8x128xf32>
    %109 = arith.addf %108, %6 : vector<8x128xf32>
    %110 = arith.mulf %98, %109 : vector<8x128xf32>
    %111 = arith.addf %107, %110 : vector<8x128xf32>
    %112 = math.tanh %111 : vector<8x128xf32>
    %cst_35 = arith.constant 1.000000e+00 : f32
    %113 = vector.broadcast %cst_35 : f32 to vector<8x128xf32>
    %114 = arith.subf %113, %106 : vector<8x128xf32>
    %115 = arith.mulf %114, %112 : vector<8x128xf32>
    %116 = arith.mulf %106, %85 : vector<8x128xf32>
    %117 = arith.addf %115, %116 : vector<8x128xf32>
    %c0_36 = arith.constant 0 : index
    %c0_37 = arith.constant 0 : index
    %118 = vector.load %arg8[%c0_36, %c0_37] : memref<8x128xf32, #tpu.memory_space<vmem>>, vector<8x128xf32>
    tpu.vector_store %arg8[%c0_36, %c0_37], %117 {strides = array<i32>} : memref<8x128xf32, #tpu.memory_space<vmem>>, vector<8x128xf32>,
    %119 = arith.truncf %117 : vector<8x128xf32> to vector<8x128xbf16>
    %120 = arith.index_cast %c2_i32 : i32 to index
    %c0_38 = arith.constant 0 : index
    %c0_39 = arith.constant 0 : index
    %121 = vector.load %arg6[%120, %c0_38, %c0_39] : memref<8x8x128xbf16, #tpu.memory_space<vmem>>, vector<1x8x128xbf16>
    %122 = vector.shape_cast %121 : vector<1x8x128xbf16> to vector<8x128xbf16>
    %123 = vector.shape_cast %119 : vector<8x128xbf16> to vector<1x8x128xbf16>
    tpu.vector_store %arg6[%120, %c0_38, %c0_39], %123 {strides = array<i32>} : memref<8x8x128xbf16, #tpu.memory_space<vmem>>, vector<1x8x128xbf16>,
    %c3_i32 = arith.constant 3 : i32
    %c0_40 = arith.constant 0 : index
    %c0_41 = arith.constant 0 : index
    %124 = vector.load %arg8[%c0_40, %c0_41] : memref<8x128xf32, #tpu.memory_space<vmem>>, vector<8x128xf32>
    %125 = arith.index_cast %c3_i32 : i32 to index
    %c0_42 = arith.constant 0 : index
    %c0_43 = arith.constant 0 : index
    %126 = vector.load %arg2[%125, %c0_42, %c0_43] : memref<8x8x384xf32, #tpu.memory_space<vmem>>, vector<1x8x384xf32>
    %127 = vector.shape_cast %126 : vector<1x8x384xf32> to vector<8x384xf32>
    %128 = arith.truncf %124 : vector<8x128xf32> to vector<8x128xbf16>
    %cst_44 = arith.constant dense<0.000000e+00> : vector<8x384xf32>
    %129 = tpu.matmul %128, %3, %cst_44 {dimension_numbers = #tpu.dot_dimension_numbers<[1], [0], [0], [1], [0, 0, 1, 1], [], []>} : vector<8x128xbf16>, vector<128x384xbf16>, vector<8x384xf32> -> vector<8x384xf32>
    %130 = vector.extract_strided_slice %127 {offsets = [0, 0], sizes = [8, 128], strides = [1, 1]} : vector<8x384xf32> to vector<8x128xf32>
    %131 = vector.extract_strided_slice %129 {offsets = [0, 0], sizes = [8, 128], strides = [1, 1]} : vector<8x384xf32> to vector<8x128xf32>
    %132 = arith.addf %130, %131 : vector<8x128xf32>
    %133 = arith.negf %132 : vector<8x128xf32>
    %134 = math.exp %133 : vector<8x128xf32>
    %cst_45 = arith.constant 1.000000e+00 : f32
    %135 = vector.broadcast %cst_45 : f32 to vector<8x128xf32>
    %136 = arith.addf %135, %134 : vector<8x128xf32>
    %137 = arith.divf %135, %136 : vector<8x128xf32>
    %138 = vector.extract_strided_slice %127 {offsets = [0, 128], sizes = [8, 128], strides = [1, 1]} : vector<8x384xf32> to vector<8x128xf32>
    %139 = vector.extract_strided_slice %129 {offsets = [0, 128], sizes = [8, 128], strides = [1, 1]} : vector<8x384xf32> to vector<8x128xf32>
    %140 = arith.addf %138, %139 : vector<8x128xf32>
    %141 = arith.negf %140 : vector<8x128xf32>
    %142 = math.exp %141 : vector<8x128xf32>
    %cst_46 = arith.constant 1.000000e+00 : f32
    %143 = vector.broadcast %cst_46 : f32 to vector<8x128xf32>
    %144 = arith.addf %143, %142 : vector<8x128xf32>
    %145 = arith.divf %143, %144 : vector<8x128xf32>
    %146 = vector.extract_strided_slice %127 {offsets = [0, 256], sizes = [8, 128], strides = [1, 1]} : vector<8x384xf32> to vector<8x128xf32>
    %147 = vector.extract_strided_slice %129 {offsets = [0, 256], sizes = [8, 128], strides = [1, 1]} : vector<8x384xf32> to vector<8x128xf32>
    %148 = arith.addf %147, %6 : vector<8x128xf32>
    %149 = arith.mulf %137, %148 : vector<8x128xf32>
    %150 = arith.addf %146, %149 : vector<8x128xf32>
    %151 = math.tanh %150 : vector<8x128xf32>
    %cst_47 = arith.constant 1.000000e+00 : f32
    %152 = vector.broadcast %cst_47 : f32 to vector<8x128xf32>
    %153 = arith.subf %152, %145 : vector<8x128xf32>
    %154 = arith.mulf %153, %151 : vector<8x128xf32>
    %155 = arith.mulf %145, %124 : vector<8x128xf32>
    %156 = arith.addf %154, %155 : vector<8x128xf32>
    %c0_48 = arith.constant 0 : index
    %c0_49 = arith.constant 0 : index
    %157 = vector.load %arg8[%c0_48, %c0_49] : memref<8x128xf32, #tpu.memory_space<vmem>>, vector<8x128xf32>
    tpu.vector_store %arg8[%c0_48, %c0_49], %156 {strides = array<i32>} : memref<8x128xf32, #tpu.memory_space<vmem>>, vector<8x128xf32>,
    %158 = arith.truncf %156 : vector<8x128xf32> to vector<8x128xbf16>
    %159 = arith.index_cast %c3_i32 : i32 to index
    %c0_50 = arith.constant 0 : index
    %c0_51 = arith.constant 0 : index
    %160 = vector.load %arg6[%159, %c0_50, %c0_51] : memref<8x8x128xbf16, #tpu.memory_space<vmem>>, vector<1x8x128xbf16>
    %161 = vector.shape_cast %160 : vector<1x8x128xbf16> to vector<8x128xbf16>
    %162 = vector.shape_cast %158 : vector<8x128xbf16> to vector<1x8x128xbf16>
    tpu.vector_store %arg6[%159, %c0_50, %c0_51], %162 {strides = array<i32>} : memref<8x8x128xbf16, #tpu.memory_space<vmem>>, vector<1x8x128xbf16>,
    %c4_i32 = arith.constant 4 : i32
    %c0_52 = arith.constant 0 : index
    %c0_53 = arith.constant 0 : index
    %163 = vector.load %arg8[%c0_52, %c0_53] : memref<8x128xf32, #tpu.memory_space<vmem>>, vector<8x128xf32>
    %164 = arith.index_cast %c4_i32 : i32 to index
    %c0_54 = arith.constant 0 : index
    %c0_55 = arith.constant 0 : index
    %165 = vector.load %arg2[%164, %c0_54, %c0_55] : memref<8x8x384xf32, #tpu.memory_space<vmem>>, vector<1x8x384xf32>
    %166 = vector.shape_cast %165 : vector<1x8x384xf32> to vector<8x384xf32>
    %167 = arith.truncf %163 : vector<8x128xf32> to vector<8x128xbf16>
    %cst_56 = arith.constant dense<0.000000e+00> : vector<8x384xf32>
    %168 = tpu.matmul %167, %3, %cst_56 {dimension_numbers = #tpu.dot_dimension_numbers<[1], [0], [0], [1], [0, 0, 1, 1], [], []>} : vector<8x128xbf16>, vector<128x384xbf16>, vector<8x384xf32> -> vector<8x384xf32>
    %169 = vector.extract_strided_slice %166 {offsets = [0, 0], sizes = [8, 128], strides = [1, 1]} : vector<8x384xf32> to vector<8x128xf32>
    %170 = vector.extract_strided_slice %168 {offsets = [0, 0], sizes = [8, 128], strides = [1, 1]} : vector<8x384xf32> to vector<8x128xf32>
    %171 = arith.addf %169, %170 : vector<8x128xf32>
    %172 = arith.negf %171 : vector<8x128xf32>
    %173 = math.exp %172 : vector<8x128xf32>
    %cst_57 = arith.constant 1.000000e+00 : f32
    %174 = vector.broadcast %cst_57 : f32 to vector<8x128xf32>
    %175 = arith.addf %174, %173 : vector<8x128xf32>
    %176 = arith.divf %174, %175 : vector<8x128xf32>
    %177 = vector.extract_strided_slice %166 {offsets = [0, 128], sizes = [8, 128], strides = [1, 1]} : vector<8x384xf32> to vector<8x128xf32>
    %178 = vector.extract_strided_slice %168 {offsets = [0, 128], sizes = [8, 128], strides = [1, 1]} : vector<8x384xf32> to vector<8x128xf32>
    %179 = arith.addf %177, %178 : vector<8x128xf32>
    %180 = arith.negf %179 : vector<8x128xf32>
    %181 = math.exp %180 : vector<8x128xf32>
    %cst_58 = arith.constant 1.000000e+00 : f32
    %182 = vector.broadcast %cst_58 : f32 to vector<8x128xf32>
    %183 = arith.addf %182, %181 : vector<8x128xf32>
    %184 = arith.divf %182, %183 : vector<8x128xf32>
    %185 = vector.extract_strided_slice %166 {offsets = [0, 256], sizes = [8, 128], strides = [1, 1]} : vector<8x384xf32> to vector<8x128xf32>
    %186 = vector.extract_strided_slice %168 {offsets = [0, 256], sizes = [8, 128], strides = [1, 1]} : vector<8x384xf32> to vector<8x128xf32>
    %187 = arith.addf %186, %6 : vector<8x128xf32>
    %188 = arith.mulf %176, %187 : vector<8x128xf32>
    %189 = arith.addf %185, %188 : vector<8x128xf32>
    %190 = math.tanh %189 : vector<8x128xf32>
    %cst_59 = arith.constant 1.000000e+00 : f32
    %191 = vector.broadcast %cst_59 : f32 to vector<8x128xf32>
    %192 = arith.subf %191, %184 : vector<8x128xf32>
    %193 = arith.mulf %192, %190 : vector<8x128xf32>
    %194 = arith.mulf %184, %163 : vector<8x128xf32>
    %195 = arith.addf %193, %194 : vector<8x128xf32>
    %c0_60 = arith.constant 0 : index
    %c0_61 = arith.constant 0 : index
    %196 = vector.load %arg8[%c0_60, %c0_61] : memref<8x128xf32, #tpu.memory_space<vmem>>, vector<8x128xf32>
    tpu.vector_store %arg8[%c0_60, %c0_61], %195 {strides = array<i32>} : memref<8x128xf32, #tpu.memory_space<vmem>>, vector<8x128xf32>,
    %197 = arith.truncf %195 : vector<8x128xf32> to vector<8x128xbf16>
    %198 = arith.index_cast %c4_i32 : i32 to index
    %c0_62 = arith.constant 0 : index
    %c0_63 = arith.constant 0 : index
    %199 = vector.load %arg6[%198, %c0_62, %c0_63] : memref<8x8x128xbf16, #tpu.memory_space<vmem>>, vector<1x8x128xbf16>
    %200 = vector.shape_cast %199 : vector<1x8x128xbf16> to vector<8x128xbf16>
    %201 = vector.shape_cast %197 : vector<8x128xbf16> to vector<1x8x128xbf16>
    tpu.vector_store %arg6[%198, %c0_62, %c0_63], %201 {strides = array<i32>} : memref<8x8x128xbf16, #tpu.memory_space<vmem>>, vector<1x8x128xbf16>,
    %c5_i32 = arith.constant 5 : i32
    %c0_64 = arith.constant 0 : index
    %c0_65 = arith.constant 0 : index
    %202 = vector.load %arg8[%c0_64, %c0_65] : memref<8x128xf32, #tpu.memory_space<vmem>>, vector<8x128xf32>
    %203 = arith.index_cast %c5_i32 : i32 to index
    %c0_66 = arith.constant 0 : index
    %c0_67 = arith.constant 0 : index
    %204 = vector.load %arg2[%203, %c0_66, %c0_67] : memref<8x8x384xf32, #tpu.memory_space<vmem>>, vector<1x8x384xf32>
    %205 = vector.shape_cast %204 : vector<1x8x384xf32> to vector<8x384xf32>
    %206 = arith.truncf %202 : vector<8x128xf32> to vector<8x128xbf16>
    %cst_68 = arith.constant dense<0.000000e+00> : vector<8x384xf32>
    %207 = tpu.matmul %206, %3, %cst_68 {dimension_numbers = #tpu.dot_dimension_numbers<[1], [0], [0], [1], [0, 0, 1, 1], [], []>} : vector<8x128xbf16>, vector<128x384xbf16>, vector<8x384xf32> -> vector<8x384xf32>
    %208 = vector.extract_strided_slice %205 {offsets = [0, 0], sizes = [8, 128], strides = [1, 1]} : vector<8x384xf32> to vector<8x128xf32>
    %209 = vector.extract_strided_slice %207 {offsets = [0, 0], sizes = [8, 128], strides = [1, 1]} : vector<8x384xf32> to vector<8x128xf32>
    %210 = arith.addf %208, %209 : vector<8x128xf32>
    %211 = arith.negf %210 : vector<8x128xf32>
    %212 = math.exp %211 : vector<8x128xf32>
    %cst_69 = arith.constant 1.000000e+00 : f32
    %213 = vector.broadcast %cst_69 : f32 to vector<8x128xf32>
    %214 = arith.addf %213, %212 : vector<8x128xf32>
    %215 = arith.divf %213, %214 : vector<8x128xf32>
    %216 = vector.extract_strided_slice %205 {offsets = [0, 128], sizes = [8, 128], strides = [1, 1]} : vector<8x384xf32> to vector<8x128xf32>
    %217 = vector.extract_strided_slice %207 {offsets = [0, 128], sizes = [8, 128], strides = [1, 1]} : vector<8x384xf32> to vector<8x128xf32>
    %218 = arith.addf %216, %217 : vector<8x128xf32>
    %219 = arith.negf %218 : vector<8x128xf32>
    %220 = math.exp %219 : vector<8x128xf32>
    %cst_70 = arith.constant 1.000000e+00 : f32
    %221 = vector.broadcast %cst_70 : f32 to vector<8x128xf32>
    %222 = arith.addf %221, %220 : vector<8x128xf32>
    %223 = arith.divf %221, %222 : vector<8x128xf32>
    %224 = vector.extract_strided_slice %205 {offsets = [0, 256], sizes = [8, 128], strides = [1, 1]} : vector<8x384xf32> to vector<8x128xf32>
    %225 = vector.extract_strided_slice %207 {offsets = [0, 256], sizes = [8, 128], strides = [1, 1]} : vector<8x384xf32> to vector<8x128xf32>
    %226 = arith.addf %225, %6 : vector<8x128xf32>
    %227 = arith.mulf %215, %226 : vector<8x128xf32>
    %228 = arith.addf %224, %227 : vector<8x128xf32>
    %229 = math.tanh %228 : vector<8x128xf32>
    %cst_71 = arith.constant 1.000000e+00 : f32
    %230 = vector.broadcast %cst_71 : f32 to vector<8x128xf32>
    %231 = arith.subf %230, %223 : vector<8x128xf32>
    %232 = arith.mulf %231, %229 : vector<8x128xf32>
    %233 = arith.mulf %223, %202 : vector<8x128xf32>
    %234 = arith.addf %232, %233 : vector<8x128xf32>
    %c0_72 = arith.constant 0 : index
    %c0_73 = arith.constant 0 : index
    %235 = vector.load %arg8[%c0_72, %c0_73] : memref<8x128xf32, #tpu.memory_space<vmem>>, vector<8x128xf32>
    tpu.vector_store %arg8[%c0_72, %c0_73], %234 {strides = array<i32>} : memref<8x128xf32, #tpu.memory_space<vmem>>, vector<8x128xf32>,
    %236 = arith.truncf %234 : vector<8x128xf32> to vector<8x128xbf16>
    %237 = arith.index_cast %c5_i32 : i32 to index
    %c0_74 = arith.constant 0 : index
    %c0_75 = arith.constant 0 : index
    %238 = vector.load %arg6[%237, %c0_74, %c0_75] : memref<8x8x128xbf16, #tpu.memory_space<vmem>>, vector<1x8x128xbf16>
    %239 = vector.shape_cast %238 : vector<1x8x128xbf16> to vector<8x128xbf16>
    %240 = vector.shape_cast %236 : vector<8x128xbf16> to vector<1x8x128xbf16>
    tpu.vector_store %arg6[%237, %c0_74, %c0_75], %240 {strides = array<i32>} : memref<8x8x128xbf16, #tpu.memory_space<vmem>>, vector<1x8x128xbf16>,
    %c6_i32 = arith.constant 6 : i32
    %c0_76 = arith.constant 0 : index
    %c0_77 = arith.constant 0 : index
    %241 = vector.load %arg8[%c0_76, %c0_77] : memref<8x128xf32, #tpu.memory_space<vmem>>, vector<8x128xf32>
    %242 = arith.index_cast %c6_i32 : i32 to index
    %c0_78 = arith.constant 0 : index
    %c0_79 = arith.constant 0 : index
    %243 = vector.load %arg2[%242, %c0_78, %c0_79] : memref<8x8x384xf32, #tpu.memory_space<vmem>>, vector<1x8x384xf32>
    %244 = vector.shape_cast %243 : vector<1x8x384xf32> to vector<8x384xf32>
    %245 = arith.truncf %241 : vector<8x128xf32> to vector<8x128xbf16>
    %cst_80 = arith.constant dense<0.000000e+00> : vector<8x384xf32>
    %246 = tpu.matmul %245, %3, %cst_80 {dimension_numbers = #tpu.dot_dimension_numbers<[1], [0], [0], [1], [0, 0, 1, 1], [], []>} : vector<8x128xbf16>, vector<128x384xbf16>, vector<8x384xf32> -> vector<8x384xf32>
    %247 = vector.extract_strided_slice %244 {offsets = [0, 0], sizes = [8, 128], strides = [1, 1]} : vector<8x384xf32> to vector<8x128xf32>
    %248 = vector.extract_strided_slice %246 {offsets = [0, 0], sizes = [8, 128], strides = [1, 1]} : vector<8x384xf32> to vector<8x128xf32>
    %249 = arith.addf %247, %248 : vector<8x128xf32>
    %250 = arith.negf %249 : vector<8x128xf32>
    %251 = math.exp %250 : vector<8x128xf32>
    %cst_81 = arith.constant 1.000000e+00 : f32
    %252 = vector.broadcast %cst_81 : f32 to vector<8x128xf32>
    %253 = arith.addf %252, %251 : vector<8x128xf32>
    %254 = arith.divf %252, %253 : vector<8x128xf32>
    %255 = vector.extract_strided_slice %244 {offsets = [0, 128], sizes = [8, 128], strides = [1, 1]} : vector<8x384xf32> to vector<8x128xf32>
    %256 = vector.extract_strided_slice %246 {offsets = [0, 128], sizes = [8, 128], strides = [1, 1]} : vector<8x384xf32> to vector<8x128xf32>
    %257 = arith.addf %255, %256 : vector<8x128xf32>
    %258 = arith.negf %257 : vector<8x128xf32>
    %259 = math.exp %258 : vector<8x128xf32>
    %cst_82 = arith.constant 1.000000e+00 : f32
    %260 = vector.broadcast %cst_82 : f32 to vector<8x128xf32>
    %261 = arith.addf %260, %259 : vector<8x128xf32>
    %262 = arith.divf %260, %261 : vector<8x128xf32>
    %263 = vector.extract_strided_slice %244 {offsets = [0, 256], sizes = [8, 128], strides = [1, 1]} : vector<8x384xf32> to vector<8x128xf32>
    %264 = vector.extract_strided_slice %246 {offsets = [0, 256], sizes = [8, 128], strides = [1, 1]} : vector<8x384xf32> to vector<8x128xf32>
    %265 = arith.addf %264, %6 : vector<8x128xf32>
    %266 = arith.mulf %254, %265 : vector<8x128xf32>
    %267 = arith.addf %263, %266 : vector<8x128xf32>
    %268 = math.tanh %267 : vector<8x128xf32>
    %cst_83 = arith.constant 1.000000e+00 : f32
    %269 = vector.broadcast %cst_83 : f32 to vector<8x128xf32>
    %270 = arith.subf %269, %262 : vector<8x128xf32>
    %271 = arith.mulf %270, %268 : vector<8x128xf32>
    %272 = arith.mulf %262, %241 : vector<8x128xf32>
    %273 = arith.addf %271, %272 : vector<8x128xf32>
    %c0_84 = arith.constant 0 : index
    %c0_85 = arith.constant 0 : index
    %274 = vector.load %arg8[%c0_84, %c0_85] : memref<8x128xf32, #tpu.memory_space<vmem>>, vector<8x128xf32>
    tpu.vector_store %arg8[%c0_84, %c0_85], %273 {strides = array<i32>} : memref<8x128xf32, #tpu.memory_space<vmem>>, vector<8x128xf32>,
    %275 = arith.truncf %273 : vector<8x128xf32> to vector<8x128xbf16>
    %276 = arith.index_cast %c6_i32 : i32 to index
    %c0_86 = arith.constant 0 : index
    %c0_87 = arith.constant 0 : index
    %277 = vector.load %arg6[%276, %c0_86, %c0_87] : memref<8x8x128xbf16, #tpu.memory_space<vmem>>, vector<1x8x128xbf16>
    %278 = vector.shape_cast %277 : vector<1x8x128xbf16> to vector<8x128xbf16>
    %279 = vector.shape_cast %275 : vector<8x128xbf16> to vector<1x8x128xbf16>
    tpu.vector_store %arg6[%276, %c0_86, %c0_87], %279 {strides = array<i32>} : memref<8x8x128xbf16, #tpu.memory_space<vmem>>, vector<1x8x128xbf16>,
    %c7_i32 = arith.constant 7 : i32
    %c0_88 = arith.constant 0 : index
    %c0_89 = arith.constant 0 : index
    %280 = vector.load %arg8[%c0_88, %c0_89] : memref<8x128xf32, #tpu.memory_space<vmem>>, vector<8x128xf32>
    %281 = arith.index_cast %c7_i32 : i32 to index
    %c0_90 = arith.constant 0 : index
    %c0_91 = arith.constant 0 : index
    %282 = vector.load %arg2[%281, %c0_90, %c0_91] : memref<8x8x384xf32, #tpu.memory_space<vmem>>, vector<1x8x384xf32>
    %283 = vector.shape_cast %282 : vector<1x8x384xf32> to vector<8x384xf32>
    %284 = arith.truncf %280 : vector<8x128xf32> to vector<8x128xbf16>
    %cst_92 = arith.constant dense<0.000000e+00> : vector<8x384xf32>
    %285 = tpu.matmul %284, %3, %cst_92 {dimension_numbers = #tpu.dot_dimension_numbers<[1], [0], [0], [1], [0, 0, 1, 1], [], []>} : vector<8x128xbf16>, vector<128x384xbf16>, vector<8x384xf32> -> vector<8x384xf32>
    %286 = vector.extract_strided_slice %283 {offsets = [0, 0], sizes = [8, 128], strides = [1, 1]} : vector<8x384xf32> to vector<8x128xf32>
    %287 = vector.extract_strided_slice %285 {offsets = [0, 0], sizes = [8, 128], strides = [1, 1]} : vector<8x384xf32> to vector<8x128xf32>
    %288 = arith.addf %286, %287 : vector<8x128xf32>
    %289 = arith.negf %288 : vector<8x128xf32>
    %290 = math.exp %289 : vector<8x128xf32>
    %cst_93 = arith.constant 1.000000e+00 : f32
    %291 = vector.broadcast %cst_93 : f32 to vector<8x128xf32>
    %292 = arith.addf %291, %290 : vector<8x128xf32>
    %293 = arith.divf %291, %292 : vector<8x128xf32>
    %294 = vector.extract_strided_slice %283 {offsets = [0, 128], sizes = [8, 128], strides = [1, 1]} : vector<8x384xf32> to vector<8x128xf32>
    %295 = vector.extract_strided_slice %285 {offsets = [0, 128], sizes = [8, 128], strides = [1, 1]} : vector<8x384xf32> to vector<8x128xf32>
    %296 = arith.addf %294, %295 : vector<8x128xf32>
    %297 = arith.negf %296 : vector<8x128xf32>
    %298 = math.exp %297 : vector<8x128xf32>
    %cst_94 = arith.constant 1.000000e+00 : f32
    %299 = vector.broadcast %cst_94 : f32 to vector<8x128xf32>
    %300 = arith.addf %299, %298 : vector<8x128xf32>
    %301 = arith.divf %299, %300 : vector<8x128xf32>
    %302 = vector.extract_strided_slice %283 {offsets = [0, 256], sizes = [8, 128], strides = [1, 1]} : vector<8x384xf32> to vector<8x128xf32>
    %303 = vector.extract_strided_slice %285 {offsets = [0, 256], sizes = [8, 128], strides = [1, 1]} : vector<8x384xf32> to vector<8x128xf32>
    %304 = arith.addf %303, %6 : vector<8x128xf32>
    %305 = arith.mulf %293, %304 : vector<8x128xf32>
    %306 = arith.addf %302, %305 : vector<8x128xf32>
    %307 = math.tanh %306 : vector<8x128xf32>
    %cst_95 = arith.constant 1.000000e+00 : f32
    %308 = vector.broadcast %cst_95 : f32 to vector<8x128xf32>
    %309 = arith.subf %308, %301 : vector<8x128xf32>
    %310 = arith.mulf %309, %307 : vector<8x128xf32>
    %311 = arith.mulf %301, %280 : vector<8x128xf32>
    %312 = arith.addf %310, %311 : vector<8x128xf32>
    %c0_96 = arith.constant 0 : index
    %c0_97 = arith.constant 0 : index
    %313 = vector.load %arg8[%c0_96, %c0_97] : memref<8x128xf32, #tpu.memory_space<vmem>>, vector<8x128xf32>
    tpu.vector_store %arg8[%c0_96, %c0_97], %312 {strides = array<i32>} : memref<8x128xf32, #tpu.memory_space<vmem>>, vector<8x128xf32>,
    %314 = arith.truncf %312 : vector<8x128xf32> to vector<8x128xbf16>
    %315 = arith.index_cast %c7_i32 : i32 to index
    %c0_98 = arith.constant 0 : index
    %c0_99 = arith.constant 0 : index
    %316 = vector.load %arg6[%315, %c0_98, %c0_99] : memref<8x8x128xbf16, #tpu.memory_space<vmem>>, vector<1x8x128xbf16>
    %317 = vector.shape_cast %316 : vector<1x8x128xbf16> to vector<8x128xbf16>
    %318 = vector.shape_cast %314 : vector<8x128xbf16> to vector<1x8x128xbf16>
    tpu.vector_store %arg6[%315, %c0_98, %c0_99], %318 {strides = array<i32>} : memref<8x8x128xbf16, #tpu.memory_space<vmem>>, vector<1x8x128xbf16>,
    %c8_i32 = arith.constant 8 : i32
    %c1_i32_100 = arith.constant 1 : i32
    %319 = arith.cmpi eq, %arg1, %c1_i32_100 : i32
    %320 = arith.extui %319 : i1 to i32
    %c0_i32_101 = arith.constant 0 : i32
    %321 = arith.cmpi ne, %320, %c0_i32_101 : i32
    scf.if %321 {
      %c0_102 = arith.constant 0 : index
      %c0_103 = arith.constant 0 : index
      %322 = vector.load %arg8[%c0_102, %c0_103] : memref<8x128xf32, #tpu.memory_space<vmem>>, vector<8x128xf32>
      %c0_104 = arith.constant 0 : index
      %c0_105 = arith.constant 0 : index
      %323 = vector.load %arg7[%c0_104, %c0_105] : memref<8x128xf32, #tpu.memory_space<vmem>>, vector<8x128xf32>
      tpu.vector_store %arg7[%c0_104, %c0_105], %322 {strides = array<i32>} : memref<8x128xf32, #tpu.memory_space<vmem>>, vector<8x128xf32>,
    } else {
    }
    return
  }
  func.func @transform_0(%arg0: i32, %arg1: i32) -> (i32, i32, i32) {
    %c0_i32 = arith.constant 0 : i32
    %c0_i32_0 = arith.constant 0 : i32
    return %arg1, %arg0, %c0_i32 : i32, i32, i32
  }
  func.func @transform_1(%arg0: i32, %arg1: i32) -> (i32, i32) {
    %c0_i32 = arith.constant 0 : i32
    %c0_i32_0 = arith.constant 0 : i32
    return %arg0, %c0_i32 : i32, i32
  }
  func.func @transform_2(%arg0: i32, %arg1: i32) -> (i32, i32) {
    %c0_i32 = arith.constant 0 : i32
    %c0_i32_0 = arith.constant 0 : i32
    %c0_i32_1 = arith.constant 0 : i32
    return %c0_i32, %c0_i32_0 : i32, i32
  }
  func.func @transform_3(%arg0: i32, %arg1: i32) -> (i32, i32) {
    %c0_i32 = arith.constant 0 : i32
    %c0_i32_0 = arith.constant 0 : i32
    %c0_i32_1 = arith.constant 0 : i32
    return %c0_i32, %c0_i32_0 : i32, i32
  }
  func.func @transform_4(%arg0: i32, %arg1: i32) -> (i32, i32, i32) {
    %c0_i32 = arith.constant 0 : i32
    %c0_i32_0 = arith.constant 0 : i32
    return %arg1, %arg0, %c0_i32 : i32, i32, i32
  }
  func.func @transform_5(%arg0: i32, %arg1: i32) -> (i32, i32) {
    %c0_i32 = arith.constant 0 : i32
    %c0_i32_0 = arith.constant 0 : i32
    return %arg0, %c0_i32 : i32, i32
  }
}

module attributes {stable_mosaic.version = 11 : i64} {
  func.func @_matmul_bias_kernel(%arg0: i32, %arg1: i32, %arg2: i32, %arg3: memref<128x128xbf16, #tpu.memory_space<vmem>>, %arg4: memref<128x256xbf16, #tpu.memory_space<vmem>>, %arg5: memref<1x256xf32, #tpu.memory_space<vmem>>, %arg6: memref<128x256xf32, #tpu.memory_space<vmem>>, %arg7: memref<128x256xf32, #tpu.memory_space<vmem>>) attributes {dimension_semantics = [#tpu.dimension_semantics<parallel>, #tpu.dimension_semantics<parallel>, #tpu.dimension_semantics<arbitrary>], iteration_bounds = array<i64: 1, 1, 1>, scalar_prefetch = 0 : i64, scratch_operands = 1 : i64, tpu.core_type = #tpu.core_type<tc>, window_params = [{transform_indices = @transform_0, window_bounds = array<i64: 128, 128>}, {transform_indices = @transform_1, window_bounds = array<i64: 128, 256>}, {transform_indices = @transform_2, window_bounds = array<i64: 1, 256>}, {transform_indices = @transform_3, window_bounds = array<i64: 128, 256>}]} {
    %c0_i32 = arith.constant 0 : i32
    %0 = arith.cmpi eq, %arg2, %c0_i32 : i32
    %1 = arith.extui %0 : i1 to i32
    %c0_i32_0 = arith.constant 0 : i32
    %2 = arith.cmpi ne, %1, %c0_i32_0 : i32
    scf.if %2 {
      %cst_10 = arith.constant 0.000000e+00 : f32
      %12 = vector.broadcast %cst_10 : f32 to vector<128x256xf32>
      %c0_11 = arith.constant 0 : index
      %c0_12 = arith.constant 0 : index
      %13 = vector.load %arg7[%c0_11, %c0_12] : memref<128x256xf32, #tpu.memory_space<vmem>>, vector<128x256xf32>
      tpu.vector_store %arg7[%c0_11, %c0_12], %12 {strides = array<i32>} : memref<128x256xf32, #tpu.memory_space<vmem>>, vector<128x256xf32>,
    } else {
    }
    %c0 = arith.constant 0 : index
    %c0_1 = arith.constant 0 : index
    %3 = vector.load %arg7[%c0, %c0_1] : memref<128x256xf32, #tpu.memory_space<vmem>>, vector<128x256xf32>
    %c0_2 = arith.constant 0 : index
    %c0_3 = arith.constant 0 : index
    %4 = vector.load %arg3[%c0_2, %c0_3] : memref<128x128xbf16, #tpu.memory_space<vmem>>, vector<128x128xbf16>
    %c0_4 = arith.constant 0 : index
    %c0_5 = arith.constant 0 : index
    %5 = vector.load %arg4[%c0_4, %c0_5] : memref<128x256xbf16, #tpu.memory_space<vmem>>, vector<128x256xbf16>
    %cst = arith.constant dense<0.000000e+00> : vector<128x256xf32>
    %6 = tpu.matmul %4, %5, %cst {dimension_numbers = #tpu.dot_dimension_numbers<[1], [0], [0], [1], [0, 0, 1, 1], [], []>} : vector<128x128xbf16>, vector<128x256xbf16>, vector<128x256xf32> -> vector<128x256xf32>
    %7 = arith.addf %3, %6 : vector<128x256xf32>
    %c0_6 = arith.constant 0 : index
    %c0_7 = arith.constant 0 : index
    %8 = vector.load %arg7[%c0_6, %c0_7] : memref<128x256xf32, #tpu.memory_space<vmem>>, vector<128x256xf32>
    tpu.vector_store %arg7[%c0_6, %c0_7], %7 {strides = array<i32>} : memref<128x256xf32, #tpu.memory_space<vmem>>, vector<128x256xf32>,
    %c0_i32_8 = arith.constant 0 : i32
    %9 = arith.cmpi eq, %arg2, %c0_i32_8 : i32
    %10 = arith.extui %9 : i1 to i32
    %c0_i32_9 = arith.constant 0 : i32
    %11 = arith.cmpi ne, %10, %c0_i32_9 : i32
    scf.if %11 {
      %c0_10 = arith.constant 0 : index
      %c0_11 = arith.constant 0 : index
      %12 = vector.load %arg7[%c0_10, %c0_11] : memref<128x256xf32, #tpu.memory_space<vmem>>, vector<128x256xf32>
      %c0_12 = arith.constant 0 : index
      %c0_13 = arith.constant 0 : index
      %13 = vector.load %arg5[%c0_12, %c0_13] : memref<1x256xf32, #tpu.memory_space<vmem>>, vector<1x256xf32>
      %14 = vector.broadcast %13 : vector<1x256xf32> to vector<128x256xf32>
      %15 = arith.addf %12, %14 : vector<128x256xf32>
      %c0_14 = arith.constant 0 : index
      %c0_15 = arith.constant 0 : index
      %16 = vector.load %arg6[%c0_14, %c0_15] : memref<128x256xf32, #tpu.memory_space<vmem>>, vector<128x256xf32>
      tpu.vector_store %arg6[%c0_14, %c0_15], %15 {strides = array<i32>} : memref<128x256xf32, #tpu.memory_space<vmem>>, vector<128x256xf32>,
    } else {
    }
    return
  }
  func.func @transform_0(%arg0: i32, %arg1: i32, %arg2: i32) -> (i32, i32) {
    %c0_i32 = arith.constant 0 : i32
    return %arg0, %arg2 : i32, i32
  }
  func.func @transform_1(%arg0: i32, %arg1: i32, %arg2: i32) -> (i32, i32) {
    %c0_i32 = arith.constant 0 : i32
    return %arg2, %arg1 : i32, i32
  }
  func.func @transform_2(%arg0: i32, %arg1: i32, %arg2: i32) -> (i32, i32) {
    %c0_i32 = arith.constant 0 : i32
    %c0_i32_0 = arith.constant 0 : i32
    return %c0_i32, %arg1 : i32, i32
  }
  func.func @transform_3(%arg0: i32, %arg1: i32, %arg2: i32) -> (i32, i32) {
    %c0_i32 = arith.constant 0 : i32
    return %arg0, %arg1 : i32, i32
  }
}

</mosaic_0001>

<bundles_post_ra>
// kernel: tpu_custom_call.1
= control target key start
LH: loop header
LB: loop body
LE: loop exit
PB: predicated region body
PF: predicated region fallthrough
CT: control target
= control target key end

     0   :  { %6 = vsyncpa [#allocation3], 0  ;;  %s341_s0 = inlined_call_operand.hbm [shape: f32[8,128], index: 0, kind: input, shape index: {}]   ;;  %s342_s1 = inlined_call_operand.hbm [shape: f32[8,128], index: 1, kind: output, shape index: {}]  }
   0x1   :  { %7 = vsyncpa [#allocation4], 0  ;;  %s262_s6 = smov 0  }
   0x2 LB: > { %s145_s7 = sadd.s32 4294967295, %s248_s6   ;;  %p146_p0 = scmp.ge.s32.totalorder %s248_s6, 1  ;;  %s248_s6 = sphi %s262_s6, %s13_s6  }
   0x3   : > { %p60_p1 = scmp.lt.s32.totalorder %s248_s6, 3  ;;  %p276_p3 = scmp.eq.s32.totalorder %s145_s7, 0 }
   0x4   : > { %s250_s10 = smov [#allocation2]   ;;  %s180_s15 = scalar_lea.hbm %s341_s0, 128 }
   0x5   : > { %p270_p2 = pnand %p146_p0, %p60_p1  ;;  %s73_s11 = sshll.u32 %s250_s10, 4  ;;  %s74_s11 = int_to_ptr.vmem [resolvable:$true] %s73_s11 }
   0x6   : > { %s347_s9 = scalar_select %p276_p3, 1, 0 }
   0x7   : > { %s346_s8 = scalar_select %p270_p2, 1, 0 }
   0x8   : > { %p162_p4 = pneg %p270_p2  ;;  %p181_p6 = scmp.ne.s32.totalorder %s341_s0, %s180_s15 }
   0x9   : > { %p187_p10 = scmp.lt.u32.totalorder %s180_s15, %s341_s0 }
   0xa   : > { %p284_p5 = pnand %p276_p3, %p162_p4 }
   0xc   : > { %p182_p7 = pneg %p284_p5 }
   0xe   : > { %p183_p8 = pnand %p182_p7, %p181_p6 }
  0x10   : > { %p184_p9 = pneg %p183_p8 }
  0x12   : > { %p189_p11 = pnand %p187_p10, %p184_p9 }
  0x14   : > { %192 = shalt.err (!%p189_p11)
}
  0x15   : > { %s193_s20 = scalar_lea.vmem %s74_s11, 128  ;;  %p201_p1 = scmp.lt.s32.totalorder %s74_s11, %s74_s11 }
  0x16   : > { %p194_p12 = scmp.ne.s32.totalorder %s74_s11, %s193_s20  ;;  %p202_p4 = scmp.lt.s32.totalorder %s193_s20, %s193_s20 }
  0x18   : > { %p196_p13 = pnand %p194_p12, %p182_p7  ;;  %p203_p3 = por %p202_p4, %p201_p1 }
  0x1a   : > { %p197_p0 = pneg %p196_p13 }
  0x1c   : > { %p204_p2 = pnand %p203_p3, %p197_p0 }
  0x1e   : > { %207 = shalt.err (!%p204_p2)
}
  0x1f   : > { %165 = dma.hbm_to_vmem [thread:$0]  (!%p284_p5), %s341_s0, 128, %s74_s11, [#allocation3]  }
  0x20   : > { %p349_p6 = scmp.ne.s32.totalorder %s346_s8, 0 }
  0x21   : > { %p350_p8 = scmp.ne.s32.totalorder (!%p349_p6), %s347_s9, 0 }
  0x22   : > { %86 = sbr.rel (%p349_p6) target bundleno = 67 (0x43), region = 24 }
  0x29   : > { %239 = dma.done.wait (%p350_p8), [#allocation3], 128  }
  0x2a   : > { %241 = vsyncadd (%p350_p8), [#allocation3], 4294967168  ;;  %s251_s23 = smov [#allocation5]   ;;  %v96_v0 = vld [vmem:[#allocation2] sm:$0xff]  ;;  %p312_p2 = scmp.eq.s32.totalorder %s145_s7, 1 }
  0x2b   : > { %s106_s24 = sshll.u32 %s251_s23, 4  ;;  %v97_v1 = vmul.f32 2.0, %v96_v0  ;;  %s107_s24 = int_to_ptr.vmem [resolvable:$true] %s106_s24 }
  0x2c   : > { %s208_s26 = scalar_lea.vmem %s107_s24, 128  ;;  %p215_p9 = scmp.lt.s32.totalorder %s107_s24, %s107_s24 }
  0x2d   : > { %98 = vst [vmem:[#allocation5] sm:$0xff] %v97_v1  ;;  %p209_p3 = scmp.ne.s32.totalorder %s107_s24, %s208_s26  ;;  %p216_p10 = scmp.lt.s32.totalorder %s208_s26, %s208_s26 }
  0x2f   : > { %p210_p5 = pnand %p209_p3, %p312_p2  ;;  %p217_p11 = por %p216_p10, %p215_p9 }
  0x31   : > { %p211_p7 = pneg %p210_p5 }
  0x33   : > { %p218_p12 = pnand %p217_p11, %p211_p7 }
  0x35   : > { %221 = shalt.err (!%p218_p12)
}
  0x36   : > { %s222_s29 = scalar_lea.hbm %s342_s1, 128 }
  0x37   : > { %p223_p13 = scmp.ne.s32.totalorder %s342_s1, %s222_s29  ;;  %p228_p4 = scmp.lt.u32.totalorder %s222_s29, %s342_s1 }
  0x39   : > { %p224_p0 = pnand %p223_p13, %p312_p2 }
  0x3b   : > { %p225_p1 = pneg %p224_p0 }
  0x3d   : > { %p230_p6 = pnand %p228_p4, %p225_p1 }
  0x3f   : > { %233 = shalt.err (!%p230_p6)
}
  0x40   : > { %159 = dma.vmem_to_hbm [thread:$0]  (%p312_p2), %s107_s24, 128, %s342_s1, [#allocation4]  }
  0x41   : > { %243 = dma.done.wait (%p312_p2), [#allocation4], 128  }
  0x42   : > { %245 = vsyncadd (%p312_p2), [#allocation4], 4294967168 }
  0x43 PF: > { %s13_s6 = sadd.s32 1, %s248_s6  }
  0x44   : > { %p10_p8 = scmp.ge.s32.totalorder %s13_s6, 4  }
  0x46   :  { %12 = sbr.rel (!%p10_p8) target bundleno = 2 (0x2), region = 53 }
  0x4d   :  { %119 = vsyncpa [#allocation3], 1 }
  0x4e   :  { %121 = vsyncpa [#allocation3 + $0x1], 1 }
  0x4f   :  { %122 = vsyncpa [#allocation4], 1 }
  0x50   :  { %124 = vsyncpa [#allocation4 + $0x1], 1 }

// kernel: general_gru_forward.5
= control target key start
LH: loop header
LB: loop body
LE: loop exit
PB: predicated region body
PF: predicated region fallthrough
CT: control target
= control target key end

     0   :  { %s1107_s12 = smov 0   ;;  %s1109_s13 = smov 0   ;;  %s1274_s0 = inlined_call_operand.vmem [shape: bf16[128,128], index: 0, kind: input, shape index: {}]   ;;  %s1275_s1 = inlined_call_operand.vmem [shape: bf16[128,384], index: 1, kind: input, shape index: {}]   ;;  %s1276_s2 = inlined_call_operand.vmem [shape: f32[1,384], index: 2, kind: input, shape index: {}]   ;;  %s1277_s3 = inlined_call_operand.vmem [shape: f32[128,384], index: 3, kind: output, shape index: {}]  }
   0x1   :  { %s1111_s14 = smov 0   ;;  %s1113_s15 = smov 0  }
   0x2   :  { %s1115_s16 = smov 0  }
   0x3 LB: > { %s28_s17 = sadd.s32 1, %s1081_s15  ;;  %s896_s18 = sadd.s32 4294967295, %s1085_s16   ;;  %s1085_s16 = sphi %s1115_s16, %s13_s16   ;;  %s1081_s15 = sphi %s1113_s15, %s1282_s15   ;;  %s1077_s14 = sphi %s1111_s14, %s1281_s14   ;;  %s1073_s13 = sphi %s1109_s13, %s1280_s13   ;;  %s1069_s12 = sphi %s1107_s12, %s1279_s12  }
   0x4   : > { %p30_p0 = scmp.ge.s32.totalorder %s28_s17, 3  ;;  %p76_p1 = scmp.ne.s32.totalorder %s1073_s13, %s1069_s12 }
   0x5   : > { %p77_p2 = scmp.eq.s32.totalorder %s1085_s16, 0  ;;  %p134_p4 = scmp.eq.s32.totalorder %s896_s18, 2 }
   0x6   : > { %s1284_s17 = smov (%p30_p0, %s28_s17), 0  ;;  %s69_s20 = sadd.s32 1, %s1073_s13 }
   0x7   : > { %p78_p3 = por %p77_p2, %p76_p1  ;;  %s65_s19 = ssub.s32 %s1081_s15, %s1284_s17 }
   0x8   : > { %p67_p5 = scmp.eq.s32.totalorder %s65_s19, 0  ;;  %p1142_p6 = por %p134_p4, %p76_p1 }
   0x9   : > { %p900_p7 = scmp.ge.s32.totalorder %s1085_s16, 3 }
   0xa   : > { %s1147_s22 = scalar_select %p67_p5, %s1073_s13, %s69_s20  }
   0xb   : > { %168 = sbr.rel (%p900_p7) target bundleno = 32 (0x20), region = 20 }
  0x12   : > { %171 = sbr.rel (!%p78_p3) target bundleno = 32 (0x20), region = 24  ;;  %s173_s23 = sand.u32 (%p78_p3), 1, %s1073_s13  }
  0x13   : > { %s902_s24 = sshll.u32 (%p78_p3), %s1081_s15, 2  ;;  %s901_s25 = sshll.u32 (%p78_p3), %s173_s23, 6 }
  0x14   : > { %s1155_s28 = scalar_lea.vmem (%p78_p3), %s1275_s1, %s902_s24  ;;  %s175_s29 = scalar_lea.vmem (%p78_p3), [#allocation3], %s901_s25 }
  0x15   : > { %v196_v0 = vld [vmem:[%s1155_s28] sm:$0xf] (%p78_p3)  ;;  %v198_v1 = vld [vmem:[%s1155_s28 + $0xc] sm:$0xf] (%p78_p3)  ;;  %v200_v2 = vld [vmem:[%s1155_s28 + $0x18] sm:$0xf] (%p78_p3) }
  0x16   : > { %197 = vst [vmem:[%s175_s29] sm:$0xf] (%p78_p3), %v196_v0  ;;  %199 = vst [vmem:[%s175_s29 + $0x4] sm:$0xf] (%p78_p3), %v198_v1  ;;  %v202_v3 = vld [vmem:[%s1155_s28 + $0x24] sm:$0xf] (%p78_p3) }
  0x17   : > { %v204_v4 = vld [vmem:[%s1155_s28 + $0x30] sm:$0xf] (%p78_p3)  ;;  %201 = vst [vmem:[%s175_s29 + $0x8] sm:$0xf] (%p78_p3), %v200_v2  ;;  %203 = vst [vmem:[%s175_s29 + $0xc] sm:$0xf] (%p78_p3), %v202_v3 }
  0x18   : > { %205 = vst [vmem:[%s175_s29 + $0x10] sm:$0xf] (%p78_p3), %v204_v4  ;;  %v206_v5 = vld [vmem:[%s1155_s28 + $0x3c] sm:$0xf] (%p78_p3)  ;;  %v208_v6 = vld [vmem:[%s1155_s28 + $0x48] sm:$0xf] (%p78_p3) }
  0x19   : > { %v210_v7 = vld [vmem:[%s1155_s28 + $0x54] sm:$0xf]  ;;  %207 = vst [vmem:[%s175_s29 + $0x14] sm:$0xf] %v206_v5  ;;  %209 = vst [vmem:[%s175_s29 + $0x18] sm:$0xf] %v208_v6 }
  0x1a   : > { %211 = vst [vmem:[%s175_s29 + $0x1c] sm:$0xf] %v210_v7  ;;  %v212_v8 = vld [vmem:[%s1155_s28 + $0x60] sm:$0xf]  ;;  %v214_v9 = vld [vmem:[%s1155_s28 + $0x6c] sm:$0xf] }
  0x1b   : > { %v216_v10 = vld [vmem:[%s1155_s28 + $0x78] sm:$0xf]  ;;  %213 = vst [vmem:[%s175_s29 + $0x20] sm:$0xf] %v212_v8  ;;  %215 = vst [vmem:[%s175_s29 + $0x24] sm:$0xf] %v214_v9 }
  0x1c   : > { %217 = vst [vmem:[%s175_s29 + $0x28] sm:$0xf] %v216_v10  ;;  %v218_v11 = vld [vmem:[%s1155_s28 + $0x84] sm:$0xf]  ;;  %v220_v12 = vld [vmem:[%s1155_s28 + $0x90] sm:$0xf] }
  0x1d   : > { %v222_v13 = vld [vmem:[%s1155_s28 + $0x9c] sm:$0xf]  ;;  %219 = vst [vmem:[%s175_s29 + $0x2c] sm:$0xf] %v218_v11  ;;  %221 = vst [vmem:[%s175_s29 + $0x30] sm:$0xf] %v220_v12 }
  0x1e   : > { %223 = vst [vmem:[%s175_s29 + $0x34] sm:$0xf] %v222_v13  ;;  %v224_v14 = vld [vmem:[%s1155_s28 + $0xa8] sm:$0xf]  ;;  %v226_v15 = vld [vmem:[%s1155_s28 + $0xb4] sm:$0xf] }
  0x1f   : > { %225 = vst [vmem:[%s175_s29 + $0x38] sm:$0xf] %v224_v14  ;;  %227 = vst [vmem:[%s175_s29 + $0x3c] sm:$0xf] %v226_v15 }
  0x20 PF: > { %p903_p8 = scmp.ge.s32.totalorder %s1085_s16, 1  ;;  %p287_p9 = scmp.lt.s32.totalorder %s1085_s16, 4 }
  0x22   : > { %p288_p10 = pnand %p903_p8, %p287_p9 }
  0x23   : > { %s294_s30 = sand.u32 (!%p288_p10), 1, %s1069_s12   ;;  %v1039_v16 = vld [vmem:[%s1274_s0] sm:$0xff] (!%p288_p10)   ;;  %v1041_v26 = vld [vmem:[%s1274_s0 + $0x8] sm:$0xff] (!%p288_p10)   ;;  %v1043_v28 = vld [vmem:[%s1274_s0 + $0x10] sm:$0xff] (!%p288_p10)   ;;  %p337_p11 = scmp.lt.s32.totalorder (!%p288_p10), %s1077_s14, 2 }
  0x24   : > { %291 = sbr.rel (%p288_p10) target bundleno = 306 (0x132), region = 69  ;;  %s904_s6 = sshll.u32 (!%p288_p10), %s294_s30, 6  ;;  %v1040_v17 = vld [vmem:[%s1274_s0 + $0x20] sm:$0xff] (!%p288_p10)   ;;  %959 = vmatprep.mubr.bf16.mxu0 (!%p288_p10), %v1039_v16  ;;  %v1042_v27 = vld [vmem:[%s1274_s0 + $0x28] sm:$0xff] (!%p288_p10)   ;;  %v1044_v29 = vld [vmem:[%s1274_s0 + $0x30] sm:$0xff] (!%p288_p10)  }
  0x25   : > { %s1184_s9 = scalar_lea.vmem (!%p288_p10), [#allocation3], %s904_s6  ;;  %967 = vmatprep.mubr.bf16.mxu1 (!%p288_p10), %v1040_v17  ;;  %v1045_v30 = vld [vmem:[%s1274_s0 + $0x18] sm:$0xff] (!%p288_p10)   ;;  %s905_s8 = sshll.u32 (!%p288_p10), %s294_s30, 7 }
  0x26   : > { %v1031_v18 = vld [vmem:[%s1184_s9] sm:$0xff] (!%p288_p10)   ;;  %v1032_v19 = vld [vmem:[%s1184_s9 + $0x8] sm:$0xff] (!%p288_p10)   ;;  %v1033_v20 = vld [vmem:[%s1184_s9 + $0x10] sm:$0xff] (!%p288_p10)  }
  0x27   : > { %943 = vmatprep.subr.bf16.mxu0 (!%p288_p10), %v1031_v18  ;;  %975 = vmatprep.subr.bf16.mxu1 (!%p288_p10), %v1031_v18  ;;  %v1034_v21 = vld [vmem:[%s1184_s9 + $0x18] sm:$0xff] (!%p288_p10)   ;;  %v1035_v22 = vld [vmem:[%s1184_s9 + $0x20] sm:$0xff] (!%p288_p10)   ;;  %v1036_v23 = vld [vmem:[%s1184_s9 + $0x28] sm:$0xff] (!%p288_p10)  }
  0x28   : > { %944 = vmatpush3.bf16.msra.mxu0 (!%p288_p10), %v1031_v18  ;;  %983 = vmatpush3.bf16.msra.mxu1 (!%p288_p10), %v1031_v18  ;;  %v1037_v24 = vld [vmem:[%s1184_s9 + $0x30] sm:$0xff] (!%p288_p10)   ;;  %v1038_v25 = vld [vmem:[%s1184_s9 + $0x38] sm:$0xff] (!%p288_p10)   ;;  %s1219_s9 = scalar_lea.vmem (!%p288_p10), [#allocation4], %s905_s8 }
  0x29   : > { %945 = vmatprep.subr.bf16.mxu0 (!%p288_p10), %v1032_v19  ;;  %976 = vmatprep.subr.bf16.mxu1 (!%p288_p10), %v1032_v19  ;;  %v1046_v31 = vld [vmem:[%s1274_s0 + $0x38] sm:$0xff] (!%p288_p10)  }
  0x2b   : > { %s338_s4 = scalar_select %p337_p11, %s1077_s14, 2 }
  0x2c   : > { %946 = vmatpush3.bf16.msra.mxu0 %v1032_v19  ;;  %984 = vmatpush3.bf16.msra.mxu1 %v1032_v19  ;;  %s924_s12 = sshll.u32 (%p1142_p6), %s1077_s14, 3 }
  0x2d   : > { %947 = vmatprep.subr.bf16.mxu0 %v1033_v20  ;;  %977 = vmatprep.subr.bf16.mxu1 %v1033_v20  ;;  %s339_s7 = scalar_lea.vmem %s1276_s2, %s338_s4  ;;  %s704_s11 = scalar_lea.vmem (%p1142_p6), %s1277_s3, %s924_s12 }
  0x2e   : > { %v922_v32 = vld [vmem:[%s339_s7] ss:$0 sm:$0xff] }
  0x30   : > { %948 = vmatpush3.bf16.msra.mxu0 %v1033_v20  ;;  %985 = vmatpush3.bf16.msra.mxu1 %v1033_v20 }
  0x31   : > { %949 = vmatprep.subr.bf16.mxu0 %v1034_v21  ;;  %978 = vmatprep.subr.bf16.mxu1 %v1034_v21 }
  0x34   : > { %950 = vmatpush3.bf16.msra.mxu0 %v1034_v21  ;;  %986 = vmatpush3.bf16.msra.mxu1 %v1034_v21 }
  0x35   : > { %951 = vmatprep.subr.bf16.mxu0 %v1035_v22  ;;  %979 = vmatprep.subr.bf16.mxu1 %v1035_v22 }
  0x38   : > { %952 = vmatpush3.bf16.msra.mxu0 %v1035_v22  ;;  %987 = vmatpush3.bf16.msra.mxu1 %v1035_v22 }
  0x39   : > { %953 = vmatprep.subr.bf16.mxu0 %v1036_v23  ;;  %980 = vmatprep.subr.bf16.mxu1 %v1036_v23 }
  0x3c   : > { %954 = vmatpush3.bf16.msra.mxu0 %v1036_v23  ;;  %988 = vmatpush3.bf16.msra.mxu1 %v1036_v23 }
  0x3d   : > { %955 = vmatprep.subr.bf16.mxu0 %v1037_v24  ;;  %981 = vmatprep.subr.bf16.mxu1 %v1037_v24 }
  0x40   : > { %956 = vmatpush3.bf16.msra.mxu0 %v1037_v24  ;;  %989 = vmatpush3.bf16.msra.mxu1 %v1037_v24 }
  0x41   : > { %957 = vmatprep.subr.bf16.mxu0 %v1038_v25  ;;  %982 = vmatprep.subr.bf16.mxu1 %v1038_v25 }
  0x44   : > { %958 = vmatpush3.bf16.msra.mxu0 %v1038_v25  ;;  %990 = vmatpush3.bf16.msra.mxu1 %v1038_v25 }
  0x47   : > { %960 = vmatmul.mubr.bf16.vlgmr.msra.gmra.mrb[0].mxu0 %v1041_v26  ;;  %968 = vmatmul.mubr.bf16.vlgmr.msra.gmra.mrb[0].mxu1 %v1042_v27 }
  0x48   : > { %963 = vmatprep.mubr.bf16.mxu0 %v1043_v28  ;;  %971 = vmatprep.mubr.bf16.mxu1 %v1044_v29 }
  0x4f   : > { %964 = vmatmul.mubr.bf16.gmra.mrb[4].mxu0 %v1045_v30  ;;  %972 = vmatmul.mubr.bf16.gmra.mrb[4].mxu1 %v1046_v31 }
 0x11a   : > { %v961_v33 = vpop.f32.mrb[0].mxu0  ;;  %v969_v34 = vpop.f32.mrb[0].mxu1 }
 0x11b   : > { %v663_v35 = vadd.f32 %v961_v33, %v922_v32  ;;  %v671_v36 = vadd.f32 %v969_v34, %v922_v32  ;;  %v540_v37 = vpop.f32.mrb[1].mxu0  ;;  %v572_v38 = vpop.f32.mrb[1].mxu1 }
 0x11c   : > { %v661_v39 = vadd.f32 %v922_v32, %v540_v37  ;;  %v669_v40 = vadd.f32 %v922_v32, %v572_v38  ;;  %v962_v41 = vpop.f32.mrb[2].mxu0  ;;  %v970_v42 = vpop.f32.mrb[2].mxu1 }
 0x11d   : > { %679 = vst [vmem:[%s1219_s9 + $0x10] sm:$0xff] %v663_v35  ;;  %687 = vst [vmem:[%s1219_s9 + $0x50] sm:$0xff] %v671_v36  ;;  %v664_v43 = vadd.f32 %v962_v41, %v922_v32  ;;  %v672_v44 = vadd.f32 %v970_v42, %v922_v32  ;;  %v543_v45 = vpop.f32.mrb[3].mxu0  ;;  %v575_v46 = vpop.f32.mrb[3].mxu1 }
 0x11e   : > { %677 = vst [vmem:[%s1219_s9] sm:$0xff] %v661_v39  ;;  %685 = vst [vmem:[%s1219_s9 + $0x40] sm:$0xff] %v669_v40  ;;  %v662_v47 = vadd.f32 %v922_v32, %v543_v45  ;;  %v670_v48 = vadd.f32 %v922_v32, %v575_v46 }
 0x11f   : > { %680 = vst [vmem:[%s1219_s9 + $0x18] sm:$0xff] %v664_v43  ;;  %688 = vst [vmem:[%s1219_s9 + $0x58] sm:$0xff] %v672_v44 }
 0x120   : > { %678 = vst [vmem:[%s1219_s9 + $0x8] sm:$0xff] %v662_v47  ;;  %686 = vst [vmem:[%s1219_s9 + $0x48] sm:$0xff] %v670_v48 }
 0x122   : > { %v965_v49 = vpop.f32.mrb[4].mxu0  ;;  %v973_v50 = vpop.f32.mrb[4].mxu1  ;;  %699 = sbr.rel (!%p1142_p6) target bundleno = 306 (0x132), region = 85 }
 0x123   : > { %v667_v51 = vadd.f32 %v965_v49, %v922_v32  ;;  %v675_v52 = vadd.f32 %v973_v50, %v922_v32  ;;  %v556_v53 = vpop.f32.mrb[5].mxu0  ;;  %v588_v54 = vpop.f32.mrb[5].mxu1 }
 0x124   : > { %v665_v55 = vadd.f32 %v922_v32, %v556_v53  ;;  %v673_v56 = vadd.f32 %v922_v32, %v588_v54  ;;  %v966_v57 = vpop.f32.mrb[6].mxu0  ;;  %v974_v58 = vpop.f32.mrb[6].mxu1  ;;  %v766_v3 = vld [vmem:[%s1219_s9 + $0x10] sm:$0xff] (%p1142_p6) }
 0x125   : > { %683 = vst [vmem:[%s1219_s9 + $0x30] sm:$0xff] %v667_v51  ;;  %691 = vst [vmem:[%s1219_s9 + $0x70] sm:$0xff] %v675_v52  ;;  %v668_v59 = vadd.f32 %v966_v57, %v922_v32  ;;  %v676_v60 = vadd.f32 %v974_v58, %v922_v32  ;;  %v559_v61 = vpop.f32.mrb[7].mxu0  ;;  %v591_v62 = vpop.f32.mrb[7].mxu1  ;;  %v762_v1 = vld [vmem:[%s1219_s9] sm:$0xff] (%p1142_p6)  ;;  %v782_v11 = vld [vmem:[%s1219_s9 + $0x50] sm:$0xff] (%p1142_p6) }
 0x126   : > { %681 = vst [vmem:[%s1219_s9 + $0x20] sm:$0xff] %v665_v55  ;;  %689 = vst [vmem:[%s1219_s9 + $0x60] sm:$0xff] %v673_v56  ;;  %v666_v63 = vadd.f32 %v922_v32, %v559_v61  ;;  %v674_v0 = vadd.f32 %v922_v32, %v591_v62  ;;  %v768_v4 = vld [vmem:[%s1219_s9 + $0x18] sm:$0xff] (%p1142_p6)  ;;  %v778_v9 = vld [vmem:[%s1219_s9 + $0x40] sm:$0xff] (%p1142_p6) }
 0x127   : > { %684 = vst [vmem:[%s1219_s9 + $0x38] sm:$0xff] %v668_v59  ;;  %692 = vst [vmem:[%s1219_s9 + $0x78] sm:$0xff] %v676_v60  ;;  %v764_v2 = vld [vmem:[%s1219_s9 + $0x8] sm:$0xff] (%p1142_p6)  ;;  %v784_v12 = vld [vmem:[%s1219_s9 + $0x58] sm:$0xff] (%p1142_p6) }
 0x128   : > { %682 = vst [vmem:[%s1219_s9 + $0x28] sm:$0xff] %v666_v63  ;;  %690 = vst [vmem:[%s1219_s9 + $0x68] sm:$0xff] %v674_v0  ;;  %v780_v10 = vld [vmem:[%s1219_s9 + $0x48] sm:$0xff] (%p1142_p6) }
 0x129   : > { %763 = vst [vmem:[%s704_s11] sm:$0xff] %v762_v1  ;;  %765 = vst [vmem:[%s704_s11 + $0x18] sm:$0xff] %v764_v2 }
 0x12a   : > { %767 = vst [vmem:[%s704_s11 + $0x30] sm:$0xff] %v766_v3  ;;  %769 = vst [vmem:[%s704_s11 + $0x48] sm:$0xff] %v768_v4 }
 0x12b   : > { %779 = vst [vmem:[%s704_s11 + $0xc0] sm:$0xff] %v778_v9  ;;  %781 = vst [vmem:[%s704_s11 + $0xd8] sm:$0xff] %v780_v10 }
 0x12c   : > { %v774_v7 = vld [vmem:[%s1219_s9 + $0x30] sm:$0xff]  ;;  %783 = vst [vmem:[%s704_s11 + $0xf0] sm:$0xff] %v782_v11  ;;  %785 = vst [vmem:[%s704_s11 + $0x108] sm:$0xff] %v784_v12 }
 0x12d   : > { %v770_v5 = vld [vmem:[%s1219_s9 + $0x20] sm:$0xff]  ;;  %775 = vst [vmem:[%s704_s11 + $0x90] sm:$0xff] %v774_v7  ;;  %v790_v15 = vld [vmem:[%s1219_s9 + $0x70] sm:$0xff] }
 0x12e   : > { %771 = vst [vmem:[%s704_s11 + $0x60] sm:$0xff] %v770_v5  ;;  %v776_v8 = vld [vmem:[%s1219_s9 + $0x38] sm:$0xff]  ;;  %v786_v13 = vld [vmem:[%s1219_s9 + $0x60] sm:$0xff]  ;;  %791 = vst [vmem:[%s704_s11 + $0x150] sm:$0xff] %v790_v15 }
 0x12f   : > { %v772_v6 = vld [vmem:[%s1219_s9 + $0x28] sm:$0xff]  ;;  %777 = vst [vmem:[%s704_s11 + $0xa8] sm:$0xff] %v776_v8  ;;  %787 = vst [vmem:[%s704_s11 + $0x120] sm:$0xff] %v786_v13  ;;  %v792_v16 = vld [vmem:[%s1219_s9 + $0x78] sm:$0xff] }
 0x130   : > { %773 = vst [vmem:[%s704_s11 + $0x78] sm:$0xff] %v772_v6  ;;  %v788_v14 = vld [vmem:[%s1219_s9 + $0x68] sm:$0xff]  ;;  %793 = vst [vmem:[%s704_s11 + $0x168] sm:$0xff] %v792_v16 }
 0x131   : > { %789 = vst [vmem:[%s704_s11 + $0x138] sm:$0xff] %v788_v14 }
 0x132 PF: > { %s13_s16 = sadd.s32 1, %s1085_s16   ;;  %s1279_s12 = smov %s1073_s13 }
 0x133   : > { %p10_p12 = scmp.ge.s32.totalorder %s13_s16, 5   ;;  %s1280_s13 = smov %s1147_s22 }
 0x134   : > { %s1281_s14 = smov %s1081_s15  ;;  %s1282_s15 = smov %s1284_s17 }
 0x135   :  { %12 = sbr.rel (!%p10_p12) target bundleno = 3 (0x3), region = 160 }

// kernel: general_gru_forward.9
= control target key start
LH: loop header
LB: loop body
LE: loop exit
PB: predicated region body
PF: predicated region fallthrough
CT: control target
= control target key end

     0   :  { %v608_v1 = vmov 0   ;;  %v457_v25 = vlaneseq  ;;  %s844_s1 = inlined_call_operand.vmem [shape: bf16[128,256], index: 1, kind: input, shape index: {}]   ;;  %s845_s0 = inlined_call_operand.vmem [shape: bf16[128,128], index: 0, kind: input, shape index: {}]   ;;  %s846_s2 = inlined_call_operand.vmem [shape: f32[1,256], index: 2, kind: input, shape index: {}]   ;;  %s847_s3 = inlined_call_operand.vmem [shape: f32[128,256], index: 3, kind: output, shape index: {}]  }
   0x1   :  { %v576_v0 = vld [vmem:[%s844_s1 + $0x4] ss:$8 sps:$4 sm:$0xff]   ;;  %275 = vmatprep.mubr.bf16.mxu0 %v608_v1  ;;  %315 = vmatprep.mubr.bf16.mxu1 %v608_v1  ;;  %v578_v2 = vld [vmem:[%s844_s1] ss:$8 sps:$4 sm:$0xff]   ;;  %v579_v3 = vld [vmem:[%s844_s1 + $0x14] ss:$8 sps:$4 sm:$0xff]  }
   0x2   :  { %243 = vmatprep.subr.bf16.mxu0 %v576_v0  ;;  %559 = vmatprep.subr.bf16.mxu1 %v576_v0  ;;  %v581_v4 = vld [vmem:[%s844_s1 + $0x10] ss:$8 sps:$4 sm:$0xff]   ;;  %v582_v5 = vld [vmem:[%s844_s1 + $0x24] ss:$8 sps:$4 sm:$0xff]   ;;  %v584_v6 = vld [vmem:[%s844_s1 + $0x20] ss:$8 sps:$4 sm:$0xff]  }
   0x3   :  { %244 = vmatpush1.bf16.msra.mxu0 %v578_v2  ;;  %567 = vmatpush1.bf16.msra.mxu1 %v578_v2  ;;  %v585_v7 = vld [vmem:[%s844_s1 + $0x34] ss:$8 sps:$4 sm:$0xff]   ;;  %v587_v8 = vld [vmem:[%s844_s1 + $0x30] ss:$8 sps:$4 sm:$0xff]   ;;  %v588_v9 = vld [vmem:[%s844_s1 + $0x44] ss:$8 sps:$4 sm:$0xff]  }
   0x4   :  { %245 = vmatprep.subr.bf16.mxu0 %v579_v3  ;;  %560 = vmatprep.subr.bf16.mxu1 %v579_v3  ;;  %v590_v10 = vld [vmem:[%s844_s1 + $0x40] ss:$8 sps:$4 sm:$0xff]   ;;  %v591_v11 = vld [vmem:[%s844_s1 + $0x54] ss:$8 sps:$4 sm:$0xff]   ;;  %v593_v12 = vld [vmem:[%s844_s1 + $0x50] ss:$8 sps:$4 sm:$0xff]  }
   0x5   :  { %v594_v13 = vld [vmem:[%s844_s1 + $0x64] ss:$8 sps:$4 sm:$0xff]   ;;  %v596_v14 = vld [vmem:[%s844_s1 + $0x60] ss:$8 sps:$4 sm:$0xff]   ;;  %v597_v15 = vld [vmem:[%s844_s1 + $0x74] ss:$8 sps:$4 sm:$0xff]  }
   0x6   :  { %v599_v16 = vld [vmem:[%s844_s1 + $0x70] ss:$8 sps:$4 sm:$0xff]   ;;  %v600_v17 = vld [vmem:[%s845_s0] sm:$0xff]   ;;  %v602_v19 = vld [vmem:[%s845_s0 + $0x8] sm:$0xff]   ;;  %v458_v26 = vshrl.u32 %v457_v25, 7 }
   0x7   :  { %246 = vmatpush1.bf16.msra.mxu0 %v581_v4  ;;  %568 = vmatpush1.bf16.msra.mxu1 %v581_v4  ;;  %v601_v18 = vld [vmem:[%s845_s0 + $0x20] sm:$0xff]   ;;  %v603_v20 = vld [vmem:[%s845_s0 + $0x28] sm:$0xff]   ;;  %v604_v21 = vld [vmem:[%s845_s0 + $0x10] sm:$0xff]  }
   0x8   :  { %247 = vmatprep.subr.bf16.mxu0 %v582_v5  ;;  %561 = vmatprep.subr.bf16.mxu1 %v582_v5  ;;  %v605_v22 = vld [vmem:[%s845_s0 + $0x30] sm:$0xff]   ;;  %v606_v23 = vld [vmem:[%s845_s0 + $0x18] sm:$0xff]   ;;  %v459_v27 = vsub.s32 0, %v458_v26  ;;  %v455_v28 = vld [vmem:[%s846_s2] sm:$0x3]  ;;  %v463_v29 = vsub.s32 1, %v458_v26 }
   0x9   :  { %v607_v24 = vld [vmem:[%s845_s0 + $0x38] sm:$0xff]  }
   0xa   :  { %v712_v30 = vrot.slane %v455_v28, %v459_v27  ;;  %v714_v31 = vrot.slane %v455_v28, %v463_v29 }
   0xb   :  { %248 = vmatpush1.bf16.msra.mxu0 %v584_v6  ;;  %569 = vmatpush1.bf16.msra.mxu1 %v584_v6 }
   0xc   :  { %249 = vmatprep.subr.bf16.mxu0 %v585_v7  ;;  %562 = vmatprep.subr.bf16.mxu1 %v585_v7 }
   0xf   :  { %250 = vmatpush1.bf16.msra.mxu0 %v587_v8  ;;  %570 = vmatpush1.bf16.msra.mxu1 %v587_v8 }
  0x10   :  { %251 = vmatprep.subr.bf16.mxu0 %v588_v9  ;;  %563 = vmatprep.subr.bf16.mxu1 %v588_v9 }
  0x13   :  { %252 = vmatpush1.bf16.msra.mxu0 %v590_v10  ;;  %571 = vmatpush1.bf16.msra.mxu1 %v590_v10 }
  0x14   :  { %253 = vmatprep.subr.bf16.mxu0 %v591_v11  ;;  %564 = vmatprep.subr.bf16.mxu1 %v591_v11 }
  0x17   :  { %254 = vmatpush1.bf16.msra.mxu0 %v593_v12  ;;  %572 = vmatpush1.bf16.msra.mxu1 %v593_v12 }
  0x18   :  { %255 = vmatprep.subr.bf16.mxu0 %v594_v13  ;;  %565 = vmatprep.subr.bf16.mxu1 %v594_v13 }
  0x1b   :  { %256 = vmatpush1.bf16.msra.mxu0 %v596_v14  ;;  %573 = vmatpush1.bf16.msra.mxu1 %v596_v14 }
  0x1c   :  { %257 = vmatprep.subr.bf16.mxu0 %v597_v15  ;;  %566 = vmatprep.subr.bf16.mxu1 %v597_v15 }
  0x1f   :  { %258 = vmatpush1.bf16.msra.mxu0 %v599_v16  ;;  %574 = vmatpush1.bf16.msra.mxu1 %v599_v16 }
  0x22   :  { %276 = vmatmul.mubr.bf16.vlgmr.msra.gmra.mrb[0].mxu0 %v600_v17  ;;  %316 = vmatmul.mubr.bf16.vlgmr.msra.gmra.mrb[0].mxu1 %v601_v18 }
  0x23   :  { %285 = vmatprep.mubr.bf16.mxu0 %v608_v1  ;;  %325 = vmatprep.mubr.bf16.mxu1 %v608_v1 }
  0x2a   :  { %286 = vmatmul.mubr.bf16.gmra.mrb[4].mxu0 %v602_v19  ;;  %326 = vmatmul.mubr.bf16.gmra.mrb[4].mxu1 %v603_v20 }
  0x2b   :  { %295 = vmatprep.mubr.bf16.mxu0 %v608_v1  ;;  %335 = vmatprep.mubr.bf16.mxu1 %v608_v1 }
  0x32   :  { %296 = vmatmul.mubr.bf16.gmra.mrb[8].mxu0 %v604_v21  ;;  %336 = vmatmul.mubr.bf16.gmra.mrb[8].mxu1 %v605_v22 }
  0x33   :  { %305 = vmatprep.mubr.bf16.mxu0 %v608_v1  ;;  %345 = vmatprep.mubr.bf16.mxu1 %v608_v1 }
  0x3a   :  { %306 = vmatmul.mubr.bf16.gmra.mrb[12].mxu0 %v606_v23  ;;  %346 = vmatmul.mubr.bf16.gmra.mrb[12].mxu1 %v607_v24 }
  0xf5   :  { %v277_v32 = vpop.f32.mrb[0].mxu0  ;;  %v317_v33 = vpop.f32.mrb[0].mxu1 }
  0xf6   :  { %v467_v34 = vadd.f32 %v712_v30, %v277_v32  ;;  %v483_v35 = vadd.f32 %v712_v30, %v317_v33  ;;  %v279_v36 = vpop.f32.mrb[1].mxu0  ;;  %v319_v37 = vpop.f32.mrb[1].mxu1 }
  0xf7   :  { %v468_v38 = vadd.f32 %v714_v31, %v279_v36  ;;  %v484_v39 = vadd.f32 %v714_v31, %v319_v37  ;;  %v281_v40 = vpop.f32.mrb[2].mxu0  ;;  %v321_v41 = vpop.f32.mrb[2].mxu1 }
  0xf8   :  { %499 = vst [vmem:[%s847_s3] sm:$0xff] %v467_v34  ;;  %515 = vst [vmem:[%s847_s3 + $0x80] sm:$0xff] %v483_v35  ;;  %v469_v42 = vadd.f32 %v712_v30, %v281_v40  ;;  %v485_v43 = vadd.f32 %v712_v30, %v321_v41  ;;  %v283_v44 = vpop.f32.mrb[3].mxu0  ;;  %v323_v45 = vpop.f32.mrb[3].mxu1 }
  0xf9   :  { %500 = vst [vmem:[%s847_s3 + $0x8] sm:$0xff] %v468_v38  ;;  %516 = vst [vmem:[%s847_s3 + $0x88] sm:$0xff] %v484_v39  ;;  %v470_v46 = vadd.f32 %v714_v31, %v283_v44  ;;  %v486_v47 = vadd.f32 %v714_v31, %v323_v45 }
  0xfa   :  { %501 = vst [vmem:[%s847_s3 + $0x10] sm:$0xff] %v469_v42  ;;  %517 = vst [vmem:[%s847_s3 + $0x90] sm:$0xff] %v485_v43 }
  0xfb   :  { %502 = vst [vmem:[%s847_s3 + $0x18] sm:$0xff] %v470_v46  ;;  %518 = vst [vmem:[%s847_s3 + $0x98] sm:$0xff] %v486_v47 }
  0xfd   :  { %v287_v48 = vpop.f32.mrb[4].mxu0  ;;  %v327_v49 = vpop.f32.mrb[4].mxu1 }
  0xfe   :  { %v471_v50 = vadd.f32 %v712_v30, %v287_v48  ;;  %v487_v51 = vadd.f32 %v712_v30, %v327_v49  ;;  %v289_v52 = vpop.f32.mrb[5].mxu0  ;;  %v329_v53 = vpop.f32.mrb[5].mxu1 }
  0xff   :  { %v472_v54 = vadd.f32 %v714_v31, %v289_v52  ;;  %v488_v55 = vadd.f32 %v714_v31, %v329_v53  ;;  %v291_v56 = vpop.f32.mrb[6].mxu0  ;;  %v331_v57 = vpop.f32.mrb[6].mxu1 }
 0x100   :  { %503 = vst [vmem:[%s847_s3 + $0x20] sm:$0xff] %v471_v50  ;;  %519 = vst [vmem:[%s847_s3 + $0xa0] sm:$0xff] %v487_v51  ;;  %v473_v58 = vadd.f32 %v712_v30, %v291_v56  ;;  %v489_v59 = vadd.f32 %v712_v30, %v331_v57  ;;  %v293_v60 = vpop.f32.mrb[7].mxu0  ;;  %v333_v61 = vpop.f32.mrb[7].mxu1 }
 0x101   :  { %504 = vst [vmem:[%s847_s3 + $0x28] sm:$0xff] %v472_v54  ;;  %520 = vst [vmem:[%s847_s3 + $0xa8] sm:$0xff] %v488_v55  ;;  %v474_v62 = vadd.f32 %v714_v31, %v293_v60  ;;  %v490_v63 = vadd.f32 %v714_v31, %v333_v61 }
 0x102   :  { %505 = vst [vmem:[%s847_s3 + $0x30] sm:$0xff] %v473_v58  ;;  %521 = vst [vmem:[%s847_s3 + $0xb0] sm:$0xff] %v489_v59 }
 0x103   :  { %506 = vst [vmem:[%s847_s3 + $0x38] sm:$0xff] %v474_v62  ;;  %522 = vst [vmem:[%s847_s3 + $0xb8] sm:$0xff] %v490_v63 }
 0x105   :  { %v297_v0 = vpop.f32.mrb[8].mxu0  ;;  %v337_v1 = vpop.f32.mrb[8].mxu1 }
 0x106   :  { %v475_v2 = vadd.f32 %v712_v30, %v297_v0  ;;  %v491_v3 = vadd.f32 %v712_v30, %v337_v1  ;;  %v299_v4 = vpop.f32.mrb[9].mxu0  ;;  %v339_v5 = vpop.f32.mrb[9].mxu1 }
 0x107   :  { %v476_v6 = vadd.f32 %v714_v31, %v299_v4  ;;  %v492_v7 = vadd.f32 %v714_v31, %v339_v5  ;;  %v301_v8 = vpop.f32.mrb[10].mxu0  ;;  %v341_v9 = vpop.f32.mrb[10].mxu1 }
 0x108   :  { %507 = vst [vmem:[%s847_s3 + $0x40] sm:$0xff] %v475_v2  ;;  %523 = vst [vmem:[%s847_s3 + $0xc0] sm:$0xff] %v491_v3  ;;  %v477_v10 = vadd.f32 %v712_v30, %v301_v8  ;;  %v493_v11 = vadd.f32 %v712_v30, %v341_v9  ;;  %v303_v12 = vpop.f32.mrb[11].mxu0  ;;  %v343_v13 = vpop.f32.mrb[11].mxu1 }
 0x109   :  { %508 = vst [vmem:[%s847_s3 + $0x48] sm:$0xff] %v476_v6  ;;  %524 = vst [vmem:[%s847_s3 + $0xc8] sm:$0xff] %v492_v7  ;;  %v478_v14 = vadd.f32 %v714_v31, %v303_v12  ;;  %v494_v15 = vadd.f32 %v714_v31, %v343_v13 }
 0x10a   :  { %509 = vst [vmem:[%s847_s3 + $0x50] sm:$0xff] %v477_v10  ;;  %525 = vst [vmem:[%s847_s3 + $0xd0] sm:$0xff] %v493_v11 }
 0x10b   :  { %510 = vst [vmem:[%s847_s3 + $0x58] sm:$0xff] %v478_v14  ;;  %526 = vst [vmem:[%s847_s3 + $0xd8] sm:$0xff] %v494_v15 }
 0x10d   :  { %v307_v16 = vpop.f32.mrb[12].mxu0  ;;  %v347_v17 = vpop.f32.mrb[12].mxu1 }
 0x10e   :  { %v479_v18 = vadd.f32 %v712_v30, %v307_v16  ;;  %v495_v19 = vadd.f32 %v712_v30, %v347_v17  ;;  %v309_v20 = vpop.f32.mrb[13].mxu0  ;;  %v349_v21 = vpop.f32.mrb[13].mxu1 }
 0x10f   :  { %v480_v22 = vadd.f32 %v714_v31, %v309_v20  ;;  %v496_v23 = vadd.f32 %v714_v31, %v349_v21  ;;  %v311_v24 = vpop.f32.mrb[14].mxu0  ;;  %v351_v25 = vpop.f32.mrb[14].mxu1 }
 0x110   :  { %511 = vst [vmem:[%s847_s3 + $0x60] sm:$0xff] %v479_v18  ;;  %527 = vst [vmem:[%s847_s3 + $0xe0] sm:$0xff] %v495_v19  ;;  %v481_v26 = vadd.f32 %v712_v30, %v311_v24  ;;  %v497_v27 = vadd.f32 %v712_v30, %v351_v25  ;;  %v313_v28 = vpop.f32.mrb[15].mxu0  ;;  %v353_v29 = vpop.f32.mrb[15].mxu1 }
 0x111   :  { %512 = vst [vmem:[%s847_s3 + $0x68] sm:$0xff] %v480_v22  ;;  %528 = vst [vmem:[%s847_s3 + $0xe8] sm:$0xff] %v496_v23  ;;  %v482_v32 = vadd.f32 %v714_v31, %v313_v28  ;;  %v498_v33 = vadd.f32 %v714_v31, %v353_v29 }
 0x112   :  { %513 = vst [vmem:[%s847_s3 + $0x70] sm:$0xff] %v481_v26  ;;  %529 = vst [vmem:[%s847_s3 + $0xf0] sm:$0xff] %v497_v27 }
 0x113   :  { %514 = vst [vmem:[%s847_s3 + $0x78] sm:$0xff] %v482_v32  ;;  %530 = vst [vmem:[%s847_s3 + $0xf8] sm:$0xff] %v498_v33 }

// kernel: general_gru_forward.6
= control target key start
LH: loop header
LB: loop body
LE: loop exit
PB: predicated region body
PF: predicated region fallthrough
CT: control target
= control target key end

     0   :  { %s2021_s18 = smov 0   ;;  %s2023_s19 = smov 0   ;;  %s2561_s0 = inlined_call_operand.vmem [shape: f32[16,8,384], index: 0, kind: input, shape index: {}]   ;;  %s2562_s1 = inlined_call_operand.vmem [shape: f32[8,128], index: 1, kind: input, shape index: {}]   ;;  %s2563_s2 = inlined_call_operand.vmem [shape: bf16[128,384], index: 2, kind: input, shape index: {}]   ;;  %s2564_s3 = inlined_call_operand.vmem [shape: f32[1,128], index: 3, kind: input, shape index: {}]   ;;  %s2565_s4 = inlined_call_operand.vmem [shape: bf16[16,8,128], index: 4, kind: output, shape index: {0}]   ;;  %s2566_s5 = inlined_call_operand.vmem [shape: f32[8,128], index: 5, kind: output, shape index: {1}]  }
   0x1   :  { %s2025_s20 = smov 0  }
   0x2 LB: > { %s25_s21 = sadd.s32 1, %s1982_s19  ;;  %p1507_p0 = scmp.ge.s32.totalorder %s1986_s20, 1  ;;  %s1986_s20 = sphi %s2025_s20, %s16_s20   ;;  %s1982_s19 = sphi %s2023_s19, %s2568_s19   ;;  %s1978_s18 = sphi %s2021_s18, %s2567_s18  }
   0x3   : > { %p26_p1 = scmp.ge.s32.totalorder %s25_s21, 2  ;;  %p221_p2 = scmp.lt.s32.totalorder %s1986_s20, 3 }
   0x5   : > { %s2570_s21 = smov (%p26_p1, %s25_s21), 0  ;;  %p222_p3 = pnand %p1507_p0, %p221_p2 }
   0x6   : > { %s1508_s22 = sshll.u32 (!%p222_p3), %s1978_s18, 3  ;;  %p1512_p5 = scmp.ne.s32.totalorder (!%p222_p3), %s1978_s18, 0 }
   0x7   : > { %225 = sbr.rel (%p222_p3) target bundleno = 2150 (0x866), region = 36  ;;  %p266_p4 = scmp.lt.s32.totalorder (!%p222_p3), %s1508_s22, 15 }
   0xe   : > { %s2572_s22 = smov (!%p266_p4, %s1508_s22), 15  ;;  %297 = sbr.rel (%p1512_p5) target bundleno = 21 (0x15), region = 40 }
   0xf   : > { %s1818_s23 = smul.u32 24, %s2572_s22  ;;  %s1511_s24 = sshll.u32 %s2572_s22, 2  ;;  %v298_v0 = vld [vmem:[%s2562_s1] sm:$0xff] (!%p1512_p5) }
  0x10   : > { %s2045_s27 = scalar_lea.vmem %s2565_s4, %s1511_s24  ;;  %299 = vst [vmem:[#allocation2] sm:$0xff] (!%p1512_p5), %v298_v0 }
  0x11   : > { %s2050_s30 = scalar_lea.vmem %s2561_s0, %s1818_s23 }
  0x15 PF: > { %v2059_v1 = vld [vmem:[%s2563_s2 + $0x4] ss:$12 sps:$4 sm:$0xff]   ;;  %v2064_v2 = vld [vmem:[%s2563_s2] ss:$12 sps:$4 sm:$0xff]   ;;  %v1988_v3 = vmov 0.0   ;;  %v1989_v4 = vmov 0  }
  0x16   : > { %1658 = vmatprep.subr.bf16.mxu1 %v1988_v3  ;;  %504 = vmatprep.mubr.bf16.mxu0 %v1989_v4  ;;  %v2072_v5 = vld [vmem:[%s2563_s2 + $0x1c] ss:$12 sps:$4 sm:$0xff]   ;;  %vm1990_vm0 = vmmov 0   ;;  %v2080_v6 = vld [vmem:[%s2563_s2 + $0x18] ss:$12 sps:$4 sm:$0xff]   ;;  %v342_v50 = vld [vmem:[%s2050_s30 + $0x10] sm:$0xff] }
  0x17   : > { %472 = vmatprep.subr.bf16.mxu0 %v2059_v1  ;;  %1674 = vmatprep.mubr.msk.bf16.mxu1 %vm1990_vm0, %v1988_v3  ;;  %v2086_v7 = vld [vmem:[%s2563_s2 + $0x34] ss:$12 sps:$4 sm:$0xff]   ;;  %v2092_v8 = vld [vmem:[%s2563_s2 + $0x30] ss:$12 sps:$4 sm:$0xff]   ;;  %v2098_v9 = vld [vmem:[%s2563_s2 + $0x4c] ss:$12 sps:$4 sm:$0xff]  }
  0x18   : > { %473 = vmatpush1.bf16.msra.mxu0 %v2064_v2  ;;  %v2103_v10 = vld [vmem:[%s2563_s2 + $0x8] ss:$12 sps:$4 sm:$0xff]   ;;  %v2116_v12 = vld [vmem:[%s2563_s2 + $0x64] ss:$12 sps:$4 sm:$0xff]   ;;  %v2122_v13 = vld [vmem:[%s2563_s2 + $0x20] ss:$12 sps:$4 sm:$0xff]  }
  0x19   : > { %474 = vmatprep.subr.bf16.mxu0 %v2072_v5  ;;  %v2109_v11 = vld [vmem:[%s2563_s2 + $0x48] ss:$12 sps:$4 sm:$0xff]   ;;  %1659 = vmatpush3.bf16.msra.mxu1 %v2103_v10  ;;  %v2127_v14 = vld [vmem:[%s2563_s2 + $0x60] ss:$12 sps:$4 sm:$0xff]   ;;  %v2134_v15 = vld [vmem:[%s2563_s2 + $0x38] ss:$12 sps:$4 sm:$0xff]  }
  0x1a   : > { %1660 = vmatprep.subr.bf16.mxu1 %v1988_v3  ;;  %v2140_v16 = vld [vmem:[%s2563_s2 + $0x7c] ss:$12 sps:$4 sm:$0xff]   ;;  %v2147_v17 = vld [vmem:[%s2563_s2 + $0x78] ss:$12 sps:$4 sm:$0xff]   ;;  %v2159_v19 = vld [vmem:[%s2563_s2 + $0x94] ss:$12 sps:$4 sm:$0xff]  }
  0x1b   : > { %v2153_v18 = vld [vmem:[%s2563_s2 + $0x50] ss:$12 sps:$4 sm:$0xff]   ;;  %v2172_v21 = vld [vmem:[%s2563_s2 + $0x68] ss:$12 sps:$4 sm:$0xff]   ;;  %v2178_v22 = vld [vmem:[%s2563_s2 + $0xac] ss:$12 sps:$4 sm:$0xff]  }
  0x1c   : > { %475 = vmatpush1.bf16.msra.mxu0 %v2080_v6  ;;  %v2166_v20 = vld [vmem:[%s2563_s2 + $0x90] ss:$12 sps:$4 sm:$0xff]   ;;  %v2185_v23 = vld [vmem:[%s2563_s2 + $0xa8] ss:$12 sps:$4 sm:$0xff]   ;;  %v2187_v24 = vld [vmem:[#allocation2] sm:$0xff]  ;;  %p1582_p6 = scmp.ne.s32.totalorder %s1978_s18, 1 }
  0x1d   : > { %476 = vmatprep.subr.bf16.mxu0 %v2086_v7  ;;  %1661 = vmatpush3.bf16.msra.mxu1 %v2122_v13  ;;  %v2193_v25 = vld [vmem:[%s2563_s2 + $0x80] ss:$12 sps:$4 sm:$0xff]   ;;  %v343_v26 = vpack.c.bf16 %v2187_v24, %v2187_v24  ;;  %v2204_v27 = vld [vmem:[%s2563_s2 + $0x98] ss:$12 sps:$4 sm:$0xff]   ;;  %v2212_v28 = vld [vmem:[%s2563_s2 + $0xb0] ss:$12 sps:$4 sm:$0xff]  }
  0x1e   : > { %1662 = vmatprep.subr.bf16.mxu1 %v1988_v3  ;;  %v340_v29 = vld [vmem:[%s2050_s30] sm:$0xff]  ;;  %v341_v32 = vld [vmem:[%s2050_s30 + $0x8] sm:$0xff]  ;;  %v1540_v60 = vld [vmem:[%s2050_s30 + $0x18] sm:$0xff] }
  0x1f   : > { %v2257_v46 = vld [vmem:[%s2564_s3] ss:$0 sm:$0xff] }
  0x20   : > { %477 = vmatpush1.bf16.msra.mxu0 %v2092_v8  ;;  %v1541_v0 = vld [vmem:[%s2050_s30 + $0x20] sm:$0xff] }
  0x21   : > { %478 = vmatprep.subr.bf16.mxu0 %v2098_v9  ;;  %1663 = vmatpush3.bf16.msra.mxu1 %v2134_v15 }
  0x22   : > { %1664 = vmatprep.subr.bf16.mxu1 %v1988_v3 }
  0x24   : > { %479 = vmatpush1.bf16.msra.mxu0 %v2109_v11 }
  0x25   : > { %480 = vmatprep.subr.bf16.mxu0 %v2116_v12  ;;  %1665 = vmatpush3.bf16.msra.mxu1 %v2153_v18 }
  0x26   : > { %1666 = vmatprep.subr.bf16.mxu1 %v1988_v3 }
  0x28   : > { %481 = vmatpush1.bf16.msra.mxu0 %v2127_v14 }
  0x29   : > { %482 = vmatprep.subr.bf16.mxu0 %v2140_v16  ;;  %1667 = vmatpush3.bf16.msra.mxu1 %v2172_v21 }
  0x2a   : > { %1668 = vmatprep.subr.bf16.mxu1 %v1988_v3 }
  0x2c   : > { %483 = vmatpush1.bf16.msra.mxu0 %v2147_v17 }
  0x2d   : > { %484 = vmatprep.subr.bf16.mxu0 %v2159_v19  ;;  %1669 = vmatpush3.bf16.msra.mxu1 %v2193_v25 }
  0x2e   : > { %1670 = vmatprep.subr.bf16.mxu1 %v1988_v3 }
  0x30   : > { %485 = vmatpush1.bf16.msra.mxu0 %v2166_v20 }
  0x31   : > { %486 = vmatprep.subr.bf16.mxu0 %v2178_v22  ;;  %1671 = vmatpush3.bf16.msra.mxu1 %v2204_v27 }
  0x32   : > { %1672 = vmatprep.subr.bf16.mxu1 %v1988_v3 }
  0x34   : > { %487 = vmatpush1.bf16.msra.mxu0 %v2185_v23 }
  0x35   : > { %584 = vmatprep.subr.bf16.mxu0 %v2059_v1  ;;  %1673 = vmatpush3.bf16.msra.mxu1 %v2212_v28 }
  0x36   : > { %1678 = vmatprep.subr.bf16.mxu1 %v1988_v3 }
  0x37   : > { %505 = vmatmul.mubr.bf16.vlgmr.msra.gmra.mrb[0].mxu0 %v343_v26 }
  0x38   : > { %585 = vmatpush1.bf16.msra.mxu0 %v2064_v2  ;;  %616 = vmatprep.mubr.bf16.mxu0 %v1989_v4 }
  0x39   : > { %586 = vmatprep.subr.bf16.mxu0 %v2072_v5  ;;  %1675 = vmatmul.mubr.bf16.vlgmr.msra.gmra.mrb[0].mxu1 %v343_v26 }
  0x3a   : > { %1679 = vmatpush3.bf16.msra.mxu1 %v2103_v10  ;;  %1694 = vmatprep.mubr.msk.bf16.mxu1 %vm1990_vm0, %v1988_v3 }
  0x3b   : > { %1680 = vmatprep.subr.bf16.mxu1 %v1988_v3 }
  0x3c   : > { %587 = vmatpush1.bf16.msra.mxu0 %v2080_v6 }
  0x3d   : > { %588 = vmatprep.subr.bf16.mxu0 %v2086_v7 }
  0x3e   : > { %1681 = vmatpush3.bf16.msra.mxu1 %v2122_v13 }
  0x3f   : > { %1682 = vmatprep.subr.bf16.mxu1 %v1988_v3 }
  0x40   : > { %589 = vmatpush1.bf16.msra.mxu0 %v2092_v8 }
  0x41   : > { %590 = vmatprep.subr.bf16.mxu0 %v2098_v9 }
  0x42   : > { %1683 = vmatpush3.bf16.msra.mxu1 %v2134_v15 }
  0x43   : > { %1684 = vmatprep.subr.bf16.mxu1 %v1988_v3 }
  0x44   : > { %591 = vmatpush1.bf16.msra.mxu0 %v2109_v11 }
  0x45   : > { %592 = vmatprep.subr.bf16.mxu0 %v2116_v12 }
  0x46   : > { %1685 = vmatpush3.bf16.msra.mxu1 %v2153_v18 }
  0x47   : > { %1686 = vmatprep.subr.bf16.mxu1 %v1988_v3 }
  0x48   : > { %593 = vmatpush1.bf16.msra.mxu0 %v2127_v14 }
  0x49   : > { %594 = vmatprep.subr.bf16.mxu0 %v2140_v16 }
  0x4a   : > { %1687 = vmatpush3.bf16.msra.mxu1 %v2172_v21 }
  0x4b   : > { %1688 = vmatprep.subr.bf16.mxu1 %v1988_v3 }
  0x4c   : > { %595 = vmatpush1.bf16.msra.mxu0 %v2147_v17 }
  0x4d   : > { %596 = vmatprep.subr.bf16.mxu0 %v2159_v19 }
  0x4e   : > { %1689 = vmatpush3.bf16.msra.mxu1 %v2193_v25 }
  0x4f   : > { %1690 = vmatprep.subr.bf16.mxu1 %v1988_v3 }
  0x50   : > { %597 = vmatpush1.bf16.msra.mxu0 %v2166_v20 }
  0x51   : > { %598 = vmatprep.subr.bf16.mxu0 %v2178_v22 }
  0x52   : > { %1691 = vmatpush3.bf16.msra.mxu1 %v2204_v27 }
  0x53   : > { %1692 = vmatprep.subr.bf16.mxu1 %v1988_v3 }
  0x54   : > { %599 = vmatpush1.bf16.msra.mxu0 %v2185_v23 }
  0x55   : > { %697 = vmatprep.subr.bf16.mxu0 %v2059_v1 }
  0x56   : > { %1693 = vmatpush3.bf16.msra.mxu1 %v2212_v28 }
  0x57   : > { %1698 = vmatprep.subr.bf16.mxu1 %v1988_v3 }
 0x10a   : > { %v506_v30 = vpop.f32.mrb[0].mxu0 }
 0x10b   : > { %v553_v31 = vadd.f32 %v506_v30, %v340_v29  ;;  %v508_v33 = vpop.f32.mrb[1].mxu0 }
 0x10c   : > { %v510_v34 = vpop.f32.mrb[2].mxu0  ;;  %v560_v37 = vadd.f32 %v508_v33, %v341_v32  ;;  %v547_v39 = vpop.f32.mrb[0].mxu1 }
 0x10d   : > { %v1538_v35 = vmul.f32 -1.442695, %v553_v31  ;;  %v511_v36 = vpop.f32.mrb[3].mxu0  ;;  %v1676_v40 = vpop.f32.mrb[1].mxu1  ;;  %v567_v48 = vadd.f32 %v2257_v46, %v547_v39 }
 0x10e   : > { %v1539_v38 = vmul.f32 -1.442695, %v560_v37  ;;  %v550_v41 = vpop.f32.mrb[2].mxu1 }
 0x10f   : > { %1878 = vpow2.f32 %v1538_v35  ;;  %v1677_v42 = vpop.f32.mrb[3].mxu1 }
 0x110   : > { %1880 = vpow2.f32 %v1539_v38  ;;  %v1542_v42 = vld [vmem:[%s2050_s30 + $0x28] sm:$0xff] }
 0x119   : > { %v1879_v43 = vpop.eup %1878 }
 0x11a   : > { %v557_v44 = vadd.f32 1.0, %v1879_v43  ;;  %v1881_v45 = vpop.eup %1880 }
 0x11b   : > { %v564_v47 = vadd.f32 1.0, %v1881_v45 }
 0x11c   : > { %1882 = vrcp.f32 %v557_v44 }
 0x11d   : > { %1884 = vrcp.f32 %v564_v47 }
 0x126   : > { %v1883_v49 = vpop.eup %1882 }
 0x127   : > { %v568_v51 = vmul.f32 %v1883_v49, %v567_v48  ;;  %v1885_v53 = vpop.eup %1884 }
 0x128   : > { %v571_v54 = vsub.f32 1.0, %v1885_v53  ;;  %v573_v56 = vmul.f32 %v1885_v53, %v2187_v24  ;;  %v1546_v53 = vld [vmem:[%s2050_s30 + $0x30] sm:$0xff] }
 0x129   : > { %v569_v52 = vadd.f32 %v568_v51, %v342_v50 }
 0x12b   : > { %1886 = vtanh.f32 %v569_v52 }
 0x135   : > { %v1887_v55 = vpop.eup %1886 }
 0x136   : > { %v572_v57 = vmul.f32 %v1887_v55, %v571_v54 }
 0x138   : > { %v2262_v58 = vadd.f32 %v573_v56, %v572_v57  ;;  %v1547_v57 = vld [vmem:[%s2050_s30 + $0x38] sm:$0xff] }
 0x13a   : > { %v576_v59 = vpack.c.bf16 %v2262_v58, %v2262_v58 }
 0x13c   : > { %577 = vst [vmem:[%s2045_s27] sm:$0xf] %v576_v59  ;;  %617 = vmatmul.mubr.bf16.vlgmr.msra.gmra.mrb[4].mxu0 %v576_v59  ;;  %1695 = vmatmul.mubr.bf16.vlgmr.msra.gmra.mrb[4].mxu1 %v576_v59 }
 0x13d   : > { %698 = vmatpush1.bf16.msra.mxu0 %v2064_v2  ;;  %1699 = vmatpush3.bf16.msra.mxu1 %v2103_v10 }
 0x13e   : > { %699 = vmatprep.subr.bf16.mxu0 %v2072_v5  ;;  %1700 = vmatprep.subr.bf16.mxu1 %v1988_v3 }
 0x13f   : > { %729 = vmatprep.mubr.bf16.mxu0 %v1989_v4  ;;  %1714 = vmatprep.mubr.msk.bf16.mxu1 %vm1990_vm0, %v1988_v3 }
 0x141   : > { %700 = vmatpush1.bf16.msra.mxu0 %v2080_v6  ;;  %1701 = vmatpush3.bf16.msra.mxu1 %v2122_v13 }
 0x142   : > { %701 = vmatprep.subr.bf16.mxu0 %v2086_v7  ;;  %1702 = vmatprep.subr.bf16.mxu1 %v1988_v3 }
 0x145   : > { %702 = vmatpush1.bf16.msra.mxu0 %v2092_v8  ;;  %1703 = vmatpush3.bf16.msra.mxu1 %v2134_v15 }
 0x146   : > { %703 = vmatprep.subr.bf16.mxu0 %v2098_v9  ;;  %1704 = vmatprep.subr.bf16.mxu1 %v1988_v3 }
 0x149   : > { %704 = vmatpush1.bf16.msra.mxu0 %v2109_v11  ;;  %1705 = vmatpush3.bf16.msra.mxu1 %v2153_v18 }
 0x14a   : > { %705 = vmatprep.subr.bf16.mxu0 %v2116_v12  ;;  %1706 = vmatprep.subr.bf16.mxu1 %v1988_v3 }
 0x14d   : > { %706 = vmatpush1.bf16.msra.mxu0 %v2127_v14  ;;  %1707 = vmatpush3.bf16.msra.mxu1 %v2172_v21 }
 0x14e   : > { %707 = vmatprep.subr.bf16.mxu0 %v2140_v16  ;;  %1708 = vmatprep.subr.bf16.mxu1 %v1988_v3 }
 0x151   : > { %708 = vmatpush1.bf16.msra.mxu0 %v2147_v17  ;;  %1709 = vmatpush3.bf16.msra.mxu1 %v2193_v25 }
 0x152   : > { %709 = vmatprep.subr.bf16.mxu0 %v2159_v19  ;;  %1710 = vmatprep.subr.bf16.mxu1 %v1988_v3 }
 0x155   : > { %710 = vmatpush1.bf16.msra.mxu0 %v2166_v20  ;;  %1711 = vmatpush3.bf16.msra.mxu1 %v2204_v27 }
 0x156   : > { %711 = vmatprep.subr.bf16.mxu0 %v2178_v22  ;;  %1712 = vmatprep.subr.bf16.mxu1 %v1988_v3 }
 0x159   : > { %712 = vmatpush1.bf16.msra.mxu0 %v2185_v23  ;;  %1713 = vmatpush3.bf16.msra.mxu1 %v2212_v28 }
 0x15a   : > { %810 = vmatprep.subr.bf16.mxu0 %v2059_v1  ;;  %1718 = vmatprep.subr.bf16.mxu1 %v1988_v3 }
 0x20f   : > { %v618_v61 = vpop.f32.mrb[4].mxu0  ;;  %v659_v62 = vpop.f32.mrb[4].mxu1 }
 0x210   : > { %v665_v63 = vadd.f32 %v1540_v60, %v618_v61  ;;  %v620_v24 = vpop.f32.mrb[5].mxu0  ;;  %v1696_v26 = vpop.f32.mrb[5].mxu1  ;;  %v679_v40 = vadd.f32 %v2257_v46, %v659_v62 }
 0x211   : > { %v622_v29 = vpop.f32.mrb[6].mxu0  ;;  %v662_v30 = vpop.f32.mrb[6].mxu1  ;;  %v672_v34 = vadd.f32 %v1541_v0, %v620_v24 }
 0x212   : > { %v1543_v31 = vmul.f32 -1.442695, %v665_v63  ;;  %v623_v32 = vpop.f32.mrb[7].mxu0  ;;  %v1697_v33 = vpop.f32.mrb[7].mxu1 }
 0x213   : > { %v1544_v35 = vmul.f32 -1.442695, %v672_v34 }
 0x214   : > { %1888 = vpow2.f32 %v1543_v31 }
 0x215   : > { %1890 = vpow2.f32 %v1544_v35  ;;  %v1548_v35 = vld [vmem:[%s2050_s30 + $0x40] sm:$0xff] }
 0x21e   : > { %v1889_v36 = vpop.eup %1888 }
 0x21f   : > { %v669_v37 = vadd.f32 1.0, %v1889_v36  ;;  %v1891_v38 = vpop.eup %1890 }
 0x220   : > { %v676_v39 = vadd.f32 1.0, %v1891_v38 }
 0x221   : > { %1892 = vrcp.f32 %v669_v37 }
 0x222   : > { %1894 = vrcp.f32 %v676_v39 }
 0x22b   : > { %v1893_v41 = vpop.eup %1892 }
 0x22c   : > { %v680_v43 = vmul.f32 %v1893_v41, %v679_v40  ;;  %v1895_v45 = vpop.eup %1894 }
 0x22d   : > { %v683_v47 = vsub.f32 1.0, %v1895_v45  ;;  %v685_v50 = vmul.f32 %v1895_v45, %v2262_v58  ;;  %v1552_v45 = vld [vmem:[%s2050_s30 + $0x48] sm:$0xff] }
 0x22e   : > { %v681_v44 = vadd.f32 %v1542_v42, %v680_v43 }
 0x230   : > { %1896 = vtanh.f32 %v681_v44 }
 0x23a   : > { %v1897_v48 = vpop.eup %1896 }
 0x23b   : > { %v684_v49 = vmul.f32 %v1897_v48, %v683_v47 }
 0x23d   : > { %v2307_v51 = vadd.f32 %v685_v50, %v684_v49  ;;  %v1553_v50 = vld [vmem:[%s2050_s30 + $0x50] sm:$0xff] }
 0x23f   : > { %v688_v52 = vpack.c.bf16 %v2307_v51, %v2307_v51 }
 0x241   : > { %1545 = vst [vmem:[%s2045_s27 + $0x4] sm:$0xf] %v688_v52  ;;  %730 = vmatmul.mubr.bf16.vlgmr.msra.gmra.mrb[8].mxu0 %v688_v52  ;;  %1715 = vmatmul.mubr.bf16.vlgmr.msra.gmra.mrb[8].mxu1 %v688_v52 }
 0x242   : > { %811 = vmatpush1.bf16.msra.mxu0 %v2064_v2  ;;  %1719 = vmatpush3.bf16.msra.mxu1 %v2103_v10 }
 0x243   : > { %812 = vmatprep.subr.bf16.mxu0 %v2072_v5  ;;  %1720 = vmatprep.subr.bf16.mxu1 %v1988_v3 }
 0x244   : > { %842 = vmatprep.mubr.bf16.mxu0 %v1989_v4  ;;  %1734 = vmatprep.mubr.msk.bf16.mxu1 %vm1990_vm0, %v1988_v3 }
 0x246   : > { %813 = vmatpush1.bf16.msra.mxu0 %v2080_v6  ;;  %1721 = vmatpush3.bf16.msra.mxu1 %v2122_v13 }
 0x247   : > { %814 = vmatprep.subr.bf16.mxu0 %v2086_v7  ;;  %1722 = vmatprep.subr.bf16.mxu1 %v1988_v3 }
 0x24a   : > { %815 = vmatpush1.bf16.msra.mxu0 %v2092_v8  ;;  %1723 = vmatpush3.bf16.msra.mxu1 %v2134_v15 }
 0x24b   : > { %816 = vmatprep.subr.bf16.mxu0 %v2098_v9  ;;  %1724 = vmatprep.subr.bf16.mxu1 %v1988_v3 }
 0x24e   : > { %817 = vmatpush1.bf16.msra.mxu0 %v2109_v11  ;;  %1725 = vmatpush3.bf16.msra.mxu1 %v2153_v18 }
 0x24f   : > { %818 = vmatprep.subr.bf16.mxu0 %v2116_v12  ;;  %1726 = vmatprep.subr.bf16.mxu1 %v1988_v3 }
 0x252   : > { %819 = vmatpush1.bf16.msra.mxu0 %v2127_v14  ;;  %1727 = vmatpush3.bf16.msra.mxu1 %v2172_v21 }
 0x253   : > { %820 = vmatprep.subr.bf16.mxu0 %v2140_v16  ;;  %1728 = vmatprep.subr.bf16.mxu1 %v1988_v3 }
 0x256   : > { %821 = vmatpush1.bf16.msra.mxu0 %v2147_v17  ;;  %1729 = vmatpush3.bf16.msra.mxu1 %v2193_v25 }
 0x257   : > { %822 = vmatprep.subr.bf16.mxu0 %v2159_v19  ;;  %1730 = vmatprep.subr.bf16.mxu1 %v1988_v3 }
 0x25a   : > { %823 = vmatpush1.bf16.msra.mxu0 %v2166_v20  ;;  %1731 = vmatpush3.bf16.msra.mxu1 %v2204_v27 }
 0x25b   : > { %824 = vmatprep.subr.bf16.mxu0 %v2178_v22  ;;  %1732 = vmatprep.subr.bf16.mxu1 %v1988_v3 }
 0x25e   : > { %825 = vmatpush1.bf16.msra.mxu0 %v2185_v23  ;;  %1733 = vmatpush3.bf16.msra.mxu1 %v2212_v28 }
 0x25f   : > { %923 = vmatprep.subr.bf16.mxu0 %v2059_v1  ;;  %1738 = vmatprep.subr.bf16.mxu1 %v1988_v3 }
 0x314   : > { %v731_v54 = vpop.f32.mrb[8].mxu0  ;;  %v772_v55 = vpop.f32.mrb[8].mxu1 }
 0x315   : > { %v778_v56 = vadd.f32 %v1546_v53, %v731_v54  ;;  %v733_v58 = vpop.f32.mrb[9].mxu0  ;;  %v1716_v59 = vpop.f32.mrb[9].mxu1  ;;  %v792_v33 = vadd.f32 %v2257_v46, %v772_v55 }
 0x316   : > { %v735_v60 = vpop.f32.mrb[10].mxu0  ;;  %v775_v61 = vpop.f32.mrb[10].mxu1  ;;  %v785_v24 = vadd.f32 %v1547_v57, %v733_v58 }
 0x317   : > { %v1549_v62 = vmul.f32 -1.442695, %v778_v56  ;;  %v736_v63 = vpop.f32.mrb[11].mxu0  ;;  %v1717_v0 = vpop.f32.mrb[11].mxu1 }
 0x318   : > { %v1550_v26 = vmul.f32 -1.442695, %v785_v24 }
 0x319   : > { %1898 = vpow2.f32 %v1549_v62 }
 0x31a   : > { %1900 = vpow2.f32 %v1550_v26  ;;  %v1554_v26 = vld [vmem:[%s2050_s30 + $0x58] sm:$0xff] }
 0x323   : > { %v1899_v29 = vpop.eup %1898 }
 0x324   : > { %v782_v30 = vadd.f32 1.0, %v1899_v29  ;;  %v1901_v31 = vpop.eup %1900 }
 0x325   : > { %v789_v32 = vadd.f32 1.0, %v1901_v31 }
 0x326   : > { %1902 = vrcp.f32 %v782_v30 }
 0x327   : > { %1904 = vrcp.f32 %v789_v32 }
 0x330   : > { %v1903_v34 = vpop.eup %1902 }
 0x331   : > { %v793_v36 = vmul.f32 %v1903_v34, %v792_v33  ;;  %v1905_v38 = vpop.eup %1904 }
 0x332   : > { %v796_v39 = vsub.f32 1.0, %v1905_v38  ;;  %v798_v42 = vmul.f32 %v1905_v38, %v2307_v51  ;;  %v1558_v38 = vld [vmem:[%s2050_s30 + $0x60] sm:$0xff] }
 0x333   : > { %v794_v37 = vadd.f32 %v1548_v35, %v793_v36 }
 0x335   : > { %1906 = vtanh.f32 %v794_v37 }
 0x33f   : > { %v1907_v40 = vpop.eup %1906 }
 0x340   : > { %v797_v41 = vmul.f32 %v1907_v40, %v796_v39 }
 0x342   : > { %v2352_v43 = vadd.f32 %v798_v42, %v797_v41  ;;  %v1559_v42 = vld [vmem:[%s2050_s30 + $0x68] sm:$0xff] }
 0x344   : > { %v801_v44 = vpack.c.bf16 %v2352_v43, %v2352_v43 }
 0x346   : > { %1551 = vst [vmem:[%s2045_s27 + $0x8] sm:$0xf] %v801_v44  ;;  %843 = vmatmul.mubr.bf16.vlgmr.msra.gmra.mrb[12].mxu0 %v801_v44  ;;  %1735 = vmatmul.mubr.bf16.vlgmr.msra.gmra.mrb[12].mxu1 %v801_v44 }
 0x347   : > { %924 = vmatpush1.bf16.msra.mxu0 %v2064_v2  ;;  %1739 = vmatpush3.bf16.msra.mxu1 %v2103_v10 }
 0x348   : > { %925 = vmatprep.subr.bf16.mxu0 %v2072_v5  ;;  %1740 = vmatprep.subr.bf16.mxu1 %v1988_v3 }
 0x349   : > { %955 = vmatprep.mubr.bf16.mxu0 %v1989_v4  ;;  %1754 = vmatprep.mubr.msk.bf16.mxu1 %vm1990_vm0, %v1988_v3 }
 0x34b   : > { %926 = vmatpush1.bf16.msra.mxu0 %v2080_v6  ;;  %1741 = vmatpush3.bf16.msra.mxu1 %v2122_v13 }
 0x34c   : > { %927 = vmatprep.subr.bf16.mxu0 %v2086_v7  ;;  %1742 = vmatprep.subr.bf16.mxu1 %v1988_v3 }
 0x34f   : > { %928 = vmatpush1.bf16.msra.mxu0 %v2092_v8  ;;  %1743 = vmatpush3.bf16.msra.mxu1 %v2134_v15 }
 0x350   : > { %929 = vmatprep.subr.bf16.mxu0 %v2098_v9  ;;  %1744 = vmatprep.subr.bf16.mxu1 %v1988_v3 }
 0x353   : > { %930 = vmatpush1.bf16.msra.mxu0 %v2109_v11  ;;  %1745 = vmatpush3.bf16.msra.mxu1 %v2153_v18 }
 0x354   : > { %931 = vmatprep.subr.bf16.mxu0 %v2116_v12  ;;  %1746 = vmatprep.subr.bf16.mxu1 %v1988_v3 }
 0x357   : > { %932 = vmatpush1.bf16.msra.mxu0 %v2127_v14  ;;  %1747 = vmatpush3.bf16.msra.mxu1 %v2172_v21 }
 0x358   : > { %933 = vmatprep.subr.bf16.mxu0 %v2140_v16  ;;  %1748 = vmatprep.subr.bf16.mxu1 %v1988_v3 }
 0x35b   : > { %934 = vmatpush1.bf16.msra.mxu0 %v2147_v17  ;;  %1749 = vmatpush3.bf16.msra.mxu1 %v2193_v25 }
 0x35c   : > { %935 = vmatprep.subr.bf16.mxu0 %v2159_v19  ;;  %1750 = vmatprep.subr.bf16.mxu1 %v1988_v3 }
 0x35f   : > { %936 = vmatpush1.bf16.msra.mxu0 %v2166_v20  ;;  %1751 = vmatpush3.bf16.msra.mxu1 %v2204_v27 }
 0x360   : > { %937 = vmatprep.subr.bf16.mxu0 %v2178_v22  ;;  %1752 = vmatprep.subr.bf16.mxu1 %v1988_v3 }
 0x363   : > { %938 = vmatpush1.bf16.msra.mxu0 %v2185_v23  ;;  %1753 = vmatpush3.bf16.msra.mxu1 %v2212_v28 }
 0x364   : > { %1036 = vmatprep.subr.bf16.mxu0 %v2059_v1  ;;  %1758 = vmatprep.subr.bf16.mxu1 %v1988_v3 }
 0x419   : > { %v844_v47 = vpop.f32.mrb[12].mxu0  ;;  %v885_v48 = vpop.f32.mrb[12].mxu1 }
 0x41a   : > { %v891_v49 = vadd.f32 %v1552_v45, %v844_v47  ;;  %v846_v51 = vpop.f32.mrb[13].mxu0  ;;  %v1736_v52 = vpop.f32.mrb[13].mxu1  ;;  %v905_v0 = vadd.f32 %v2257_v46, %v885_v48 }
 0x41b   : > { %v848_v53 = vpop.f32.mrb[14].mxu0  ;;  %v888_v54 = vpop.f32.mrb[14].mxu1  ;;  %v898_v58 = vadd.f32 %v1553_v50, %v846_v51 }
 0x41c   : > { %v1555_v55 = vmul.f32 -1.442695, %v891_v49  ;;  %v849_v56 = vpop.f32.mrb[15].mxu0  ;;  %v1737_v57 = vpop.f32.mrb[15].mxu1 }
 0x41d   : > { %v1556_v59 = vmul.f32 -1.442695, %v898_v58 }
 0x41e   : > { %1908 = vpow2.f32 %v1555_v55 }
 0x41f   : > { %1910 = vpow2.f32 %v1556_v59  ;;  %v1560_v59 = vld [vmem:[%s2050_s30 + $0x70] sm:$0xff] }
 0x428   : > { %v1909_v60 = vpop.eup %1908 }
 0x429   : > { %v895_v61 = vadd.f32 1.0, %v1909_v60  ;;  %v1911_v62 = vpop.eup %1910 }
 0x42a   : > { %v902_v63 = vadd.f32 1.0, %v1911_v62 }
 0x42b   : > { %1912 = vrcp.f32 %v895_v61 }
 0x42c   : > { %1914 = vrcp.f32 %v902_v63 }
 0x435   : > { %v1913_v24 = vpop.eup %1912 }
 0x436   : > { %v906_v29 = vmul.f32 %v1913_v24, %v905_v0  ;;  %v1915_v31 = vpop.eup %1914 }
 0x437   : > { %v909_v32 = vsub.f32 1.0, %v1915_v31  ;;  %v911_v35 = vmul.f32 %v1915_v31, %v2352_v43 }
 0x438   : > { %v907_v30 = vadd.f32 %v1554_v26, %v906_v29 }
 0x43a   : > { %1916 = vtanh.f32 %v907_v30 }
 0x444   : > { %v1917_v33 = vpop.eup %1916 }
 0x445   : > { %v910_v34 = vmul.f32 %v1917_v33, %v909_v32 }
 0x447   : > { %v2397_v36 = vadd.f32 %v911_v35, %v910_v34 }
 0x449   : > { %v914_v37 = vpack.c.bf16 %v2397_v36, %v2397_v36 }
 0x44b   : > { %1557 = vst [vmem:[%s2045_s27 + $0xc] sm:$0xf] %v914_v37  ;;  %956 = vmatmul.mubr.bf16.vlgmr.msra.gmra.mrb[16].mxu0 %v914_v37  ;;  %1755 = vmatmul.mubr.bf16.vlgmr.msra.gmra.mrb[16].mxu1 %v914_v37 }
 0x44c   : > { %1037 = vmatpush1.bf16.msra.mxu0 %v2064_v2  ;;  %1759 = vmatpush3.bf16.msra.mxu1 %v2103_v10 }
 0x44d   : > { %1038 = vmatprep.subr.bf16.mxu0 %v2072_v5  ;;  %1760 = vmatprep.subr.bf16.mxu1 %v1988_v3 }
 0x44e   : > { %1068 = vmatprep.mubr.bf16.mxu0 %v1989_v4  ;;  %1774 = vmatprep.mubr.msk.bf16.mxu1 %vm1990_vm0, %v1988_v3 }
 0x450   : > { %1039 = vmatpush1.bf16.msra.mxu0 %v2080_v6  ;;  %1761 = vmatpush3.bf16.msra.mxu1 %v2122_v13 }
 0x451   : > { %1040 = vmatprep.subr.bf16.mxu0 %v2086_v7  ;;  %1762 = vmatprep.subr.bf16.mxu1 %v1988_v3 }
 0x454   : > { %1041 = vmatpush1.bf16.msra.mxu0 %v2092_v8  ;;  %1763 = vmatpush3.bf16.msra.mxu1 %v2134_v15 }
 0x455   : > { %1042 = vmatprep.subr.bf16.mxu0 %v2098_v9  ;;  %1764 = vmatprep.subr.bf16.mxu1 %v1988_v3 }
 0x458   : > { %1043 = vmatpush1.bf16.msra.mxu0 %v2109_v11  ;;  %1765 = vmatpush3.bf16.msra.mxu1 %v2153_v18 }
 0x459   : > { %1044 = vmatprep.subr.bf16.mxu0 %v2116_v12  ;;  %1766 = vmatprep.subr.bf16.mxu1 %v1988_v3 }
 0x45c   : > { %1045 = vmatpush1.bf16.msra.mxu0 %v2127_v14  ;;  %1767 = vmatpush3.bf16.msra.mxu1 %v2172_v21 }
 0x45d   : > { %1046 = vmatprep.subr.bf16.mxu0 %v2140_v16  ;;  %1768 = vmatprep.subr.bf16.mxu1 %v1988_v3 }
 0x460   : > { %1047 = vmatpush1.bf16.msra.mxu0 %v2147_v17  ;;  %1769 = vmatpush3.bf16.msra.mxu1 %v2193_v25 }
 0x461   : > { %1048 = vmatprep.subr.bf16.mxu0 %v2159_v19  ;;  %1770 = vmatprep.subr.bf16.mxu1 %v1988_v3 }
 0x464   : > { %1049 = vmatpush1.bf16.msra.mxu0 %v2166_v20  ;;  %1771 = vmatpush3.bf16.msra.mxu1 %v2204_v27 }
 0x465   : > { %1050 = vmatprep.subr.bf16.mxu0 %v2178_v22  ;;  %1772 = vmatprep.subr.bf16.mxu1 %v1988_v3 }
 0x468   : > { %1051 = vmatpush1.bf16.msra.mxu0 %v2185_v23  ;;  %1773 = vmatpush3.bf16.msra.mxu1 %v2212_v28 }
 0x469   : > { %1149 = vmatprep.subr.bf16.mxu0 %v2059_v1  ;;  %1778 = vmatprep.subr.bf16.mxu1 %v1988_v3 }
 0x51e   : > { %v957_v39 = vpop.f32.mrb[16].mxu0  ;;  %v998_v40 = vpop.f32.mrb[16].mxu1 }
 0x51f   : > { %v1004_v41 = vadd.f32 %v1558_v38, %v957_v39  ;;  %v959_v43 = vpop.f32.mrb[17].mxu0  ;;  %v1756_v44 = vpop.f32.mrb[17].mxu1  ;;  %v1018_v57 = vadd.f32 %v2257_v46, %v998_v40 }
 0x520   : > { %v961_v45 = vpop.f32.mrb[18].mxu0  ;;  %v1001_v47 = vpop.f32.mrb[18].mxu1  ;;  %v1011_v51 = vadd.f32 %v1559_v42, %v959_v43  ;;  %v1566_v44 = vld [vmem:[%s2050_s30 + $0x88] sm:$0xff] }
 0x521   : > { %v1561_v48 = vmul.f32 -1.442695, %v1004_v41  ;;  %v962_v49 = vpop.f32.mrb[19].mxu0  ;;  %v1757_v50 = vpop.f32.mrb[19].mxu1 }
 0x522   : > { %v1562_v52 = vmul.f32 -1.442695, %v1011_v51 }
 0x523   : > { %1918 = vpow2.f32 %v1561_v48 }
 0x524   : > { %1920 = vpow2.f32 %v1562_v52 }
 0x52d   : > { %v1919_v53 = vpop.eup %1918 }
 0x52e   : > { %v1008_v54 = vadd.f32 1.0, %v1919_v53  ;;  %v1921_v55 = vpop.eup %1920 }
 0x52f   : > { %v1015_v56 = vadd.f32 1.0, %v1921_v55  ;;  %v1958_v55 = vld [vmem:[%s2563_s2] ss:$12 sps:$4 sm:$0xff]  }
 0x530   : > { %1922 = vrcp.f32 %v1008_v54 }
 0x531   : > { %1924 = vrcp.f32 %v1015_v56  ;;  %v1959_v56 = vld [vmem:[%s2563_s2 + $0x1c] ss:$12 sps:$4 sm:$0xff]  }
 0x53a   : > { %v1923_v58 = vpop.eup %1922 }
 0x53b   : > { %v1019_v60 = vmul.f32 %v1923_v58, %v1018_v57  ;;  %v1925_v62 = vpop.eup %1924  ;;  %v1960_v57 = vld [vmem:[%s2563_s2 + $0x18] ss:$12 sps:$4 sm:$0xff]  }
 0x53c   : > { %v1022_v63 = vsub.f32 1.0, %v1925_v62  ;;  %v1024_v26 = vmul.f32 %v1925_v62, %v2397_v36  ;;  %v1963_v58 = vld [vmem:[%s2563_s2 + $0x4c] ss:$12 sps:$4 sm:$0xff]   ;;  %v1572_v62 = vld [vmem:[%s2050_s30 + $0xa0] sm:$0xff] }
 0x53d   : > { %v1020_v61 = vadd.f32 %v1560_v59, %v1019_v60 }
 0x53f   : > { %1926 = vtanh.f32 %v1020_v61 }
 0x549   : > { %v1927_v0 = vpop.eup %1926 }
 0x54a   : > { %v1023_v24 = vmul.f32 %v1927_v0, %v1022_v63 }
 0x54c   : > { %v2442_v29 = vadd.f32 %v1024_v26, %v1023_v24 }
 0x54e   : > { %v1027_v30 = vpack.c.bf16 %v2442_v29, %v2442_v29 }
 0x550   : > { %1563 = vst [vmem:[%s2045_s27 + $0x10] sm:$0xf] %v1027_v30  ;;  %1069 = vmatmul.mubr.bf16.vlgmr.msra.gmra.mrb[20].mxu0 %v1027_v30  ;;  %1775 = vmatmul.mubr.bf16.vlgmr.msra.gmra.mrb[20].mxu1 %v1027_v30 }
 0x551   : > { %1150 = vmatpush1.bf16.msra.mxu0 %v2064_v2  ;;  %1779 = vmatpush3.bf16.msra.mxu1 %v2103_v10  ;;  %v1564_v2 = vld [vmem:[%s2050_s30 + $0x78] sm:$0xff] }
 0x552   : > { %1151 = vmatprep.subr.bf16.mxu0 %v2072_v5  ;;  %1780 = vmatprep.subr.bf16.mxu1 %v1988_v3 }
 0x553   : > { %1181 = vmatprep.mubr.bf16.mxu0 %v1989_v4  ;;  %1794 = vmatprep.mubr.msk.bf16.mxu1 %vm1990_vm0, %v1988_v3 }
 0x555   : > { %1152 = vmatpush1.bf16.msra.mxu0 %v2080_v6  ;;  %1781 = vmatpush3.bf16.msra.mxu1 %v2122_v13 }
 0x556   : > { %1153 = vmatprep.subr.bf16.mxu0 %v2086_v7  ;;  %1782 = vmatprep.subr.bf16.mxu1 %v1988_v3 }
 0x559   : > { %1154 = vmatpush1.bf16.msra.mxu0 %v2092_v8  ;;  %1783 = vmatpush3.bf16.msra.mxu1 %v2134_v15  ;;  %v1565_v8 = vld [vmem:[%s2050_s30 + $0x80] sm:$0xff] }
 0x55a   : > { %1155 = vmatprep.subr.bf16.mxu0 %v2098_v9  ;;  %1784 = vmatprep.subr.bf16.mxu1 %v1988_v3 }
 0x55d   : > { %1156 = vmatpush1.bf16.msra.mxu0 %v2109_v11  ;;  %1785 = vmatpush3.bf16.msra.mxu1 %v2153_v18 }
 0x55e   : > { %1157 = vmatprep.subr.bf16.mxu0 %v2116_v12  ;;  %1786 = vmatprep.subr.bf16.mxu1 %v1988_v3 }
 0x561   : > { %1158 = vmatpush1.bf16.msra.mxu0 %v2127_v14  ;;  %1787 = vmatpush3.bf16.msra.mxu1 %v2172_v21 }
 0x562   : > { %1159 = vmatprep.subr.bf16.mxu0 %v2140_v16  ;;  %1788 = vmatprep.subr.bf16.mxu1 %v1988_v3 }
 0x565   : > { %1160 = vmatpush1.bf16.msra.mxu0 %v2147_v17  ;;  %1789 = vmatpush3.bf16.msra.mxu1 %v2193_v25 }
 0x566   : > { %1161 = vmatprep.subr.bf16.mxu0 %v2159_v19  ;;  %1790 = vmatprep.subr.bf16.mxu1 %v1988_v3 }
 0x569   : > { %1162 = vmatpush1.bf16.msra.mxu0 %v2166_v20  ;;  %1791 = vmatpush3.bf16.msra.mxu1 %v2204_v27 }
 0x56a   : > { %1163 = vmatprep.subr.bf16.mxu0 %v2178_v22  ;;  %1792 = vmatprep.subr.bf16.mxu1 %v1988_v3 }
 0x56d   : > { %1164 = vmatpush1.bf16.msra.mxu0 %v2185_v23  ;;  %1793 = vmatpush3.bf16.msra.mxu1 %v2212_v28 }
 0x56e   : > { %1262 = vmatprep.subr.bf16.mxu0 %v2059_v1  ;;  %1798 = vmatprep.subr.bf16.mxu1 %v1988_v3 }
 0x623   : > { %v1070_v5 = vpop.f32.mrb[20].mxu0  ;;  %v1111_v6 = vpop.f32.mrb[20].mxu1 }
 0x624   : > { %v1117_v7 = vadd.f32 %v1564_v2, %v1070_v5  ;;  %v1072_v9 = vpop.f32.mrb[21].mxu0  ;;  %v1776_v31 = vpop.f32.mrb[21].mxu1  ;;  %v1131_v42 = vadd.f32 %v2257_v46, %v1111_v6 }
 0x625   : > { %v1074_v32 = vpop.f32.mrb[22].mxu0  ;;  %v1114_v33 = vpop.f32.mrb[22].mxu1  ;;  %v1124_v37 = vadd.f32 %v1565_v8, %v1072_v9 }
 0x626   : > { %v1567_v34 = vmul.f32 -1.442695, %v1117_v7  ;;  %v1075_v35 = vpop.f32.mrb[23].mxu0  ;;  %v1777_v36 = vpop.f32.mrb[23].mxu1  ;;  %v1576_v7 = vld [vmem:[%s2050_s30 + $0xa8] sm:$0xff]  ;;  %v1577_v32 = vld [vmem:[%s2050_s30 + $0xb0] sm:$0xff] }
 0x627   : > { %v1568_v38 = vmul.f32 -1.442695, %v1124_v37 }
 0x628   : > { %1928 = vpow2.f32 %v1567_v34 }
 0x629   : > { %1930 = vpow2.f32 %v1568_v38 }
 0x632   : > { %v1929_v1 = vpop.eup %1928 }
 0x633   : > { %v1121_v39 = vadd.f32 1.0, %v1929_v1  ;;  %v1931_v40 = vpop.eup %1930 }
 0x634   : > { %v1128_v41 = vadd.f32 1.0, %v1931_v40 }
 0x635   : > { %1932 = vrcp.f32 %v1121_v39 }
 0x636   : > { %1934 = vrcp.f32 %v1128_v41 }
 0x63f   : > { %v1933_v43 = vpop.eup %1932 }
 0x640   : > { %v1132_v45 = vmul.f32 %v1933_v43, %v1131_v42  ;;  %v1935_v48 = vpop.eup %1934 }
 0x641   : > { %v1135_v49 = vsub.f32 1.0, %v1935_v48  ;;  %v1137_v52 = vmul.f32 %v1935_v48, %v2442_v29  ;;  %v1578_v48 = vld [vmem:[%s2050_s30 + $0xb8] sm:$0xff] }
 0x642   : > { %v1133_v47 = vadd.f32 %v1566_v44, %v1132_v45 }
 0x644   : > { %1936 = vtanh.f32 %v1133_v47 }
 0x64e   : > { %v1937_v50 = vpop.eup %1936 }
 0x64f   : > { %v1136_v51 = vmul.f32 %v1937_v50, %v1135_v49 }
 0x651   : > { %v2487_v53 = vadd.f32 %v1137_v52, %v1136_v51 }
 0x653   : > { %v1140_v54 = vpack.c.bf16 %v2487_v53, %v2487_v53 }
 0x655   : > { %1569 = vst [vmem:[%s2045_s27 + $0x14] sm:$0xf] %v1140_v54  ;;  %1182 = vmatmul.mubr.bf16.vlgmr.msra.gmra.mrb[24].mxu0 %v1140_v54  ;;  %1795 = vmatmul.mubr.bf16.vlgmr.msra.gmra.mrb[24].mxu1 %v1140_v54 }
 0x656   : > { %1263 = vmatpush1.bf16.msra.mxu0 %v1958_v55  ;;  %1799 = vmatpush3.bf16.msra.mxu1 %v2103_v10  ;;  %v1961_v10 = vld [vmem:[%s2563_s2 + $0x34] ss:$12 sps:$4 sm:$0xff]  }
 0x657   : > { %1264 = vmatprep.subr.bf16.mxu0 %v1959_v56  ;;  %1800 = vmatprep.subr.bf16.mxu1 %v1988_v3 }
 0x658   : > { %1294 = vmatprep.mubr.bf16.mxu0 %v1989_v4  ;;  %1814 = vmatprep.mubr.msk.bf16.mxu1 %vm1990_vm0, %v1988_v3  ;;  %v1962_v4 = vld [vmem:[%s2563_s2 + $0x30] ss:$12 sps:$4 sm:$0xff]  }
 0x65a   : > { %1265 = vmatpush1.bf16.msra.mxu0 %v1960_v57  ;;  %1801 = vmatpush3.bf16.msra.mxu1 %v2122_v13 }
 0x65b   : > { %1266 = vmatprep.subr.bf16.mxu0 %v1961_v10  ;;  %1802 = vmatprep.subr.bf16.mxu1 %v1988_v3 }
 0x65e   : > { %1267 = vmatpush1.bf16.msra.mxu0 %v1962_v4  ;;  %1803 = vmatpush3.bf16.msra.mxu1 %v2134_v15  ;;  %v1571_v15 = vld [vmem:[%s2050_s30 + $0x98] sm:$0xff] }
 0x65f   : > { %1268 = vmatprep.subr.bf16.mxu0 %v1963_v58  ;;  %1804 = vmatprep.subr.bf16.mxu1 %v1988_v3 }
 0x662   : > { %1269 = vmatpush1.bf16.msra.mxu0 %v2109_v11  ;;  %1805 = vmatpush3.bf16.msra.mxu1 %v2153_v18  ;;  %v1570_v11 = vld [vmem:[%s2050_s30 + $0x90] sm:$0xff] }
 0x663   : > { %1270 = vmatprep.subr.bf16.mxu0 %v2116_v12  ;;  %1806 = vmatprep.subr.bf16.mxu1 %v1988_v3 }
 0x666   : > { %1271 = vmatpush1.bf16.msra.mxu0 %v2127_v14  ;;  %1807 = vmatpush3.bf16.msra.mxu1 %v2172_v21 }
 0x667   : > { %1272 = vmatprep.subr.bf16.mxu0 %v2140_v16  ;;  %1808 = vmatprep.subr.bf16.mxu1 %v1988_v3 }
 0x66a   : > { %1273 = vmatpush1.bf16.msra.mxu0 %v2147_v17  ;;  %1809 = vmatpush3.bf16.msra.mxu1 %v2193_v25 }
 0x66b   : > { %1274 = vmatprep.subr.bf16.mxu0 %v2159_v19  ;;  %1810 = vmatprep.subr.bf16.mxu1 %v1988_v3 }
 0x66e   : > { %1275 = vmatpush1.bf16.msra.mxu0 %v2166_v20  ;;  %1811 = vmatpush3.bf16.msra.mxu1 %v2204_v27 }
 0x66f   : > { %1276 = vmatprep.subr.bf16.mxu0 %v2178_v22  ;;  %1812 = vmatprep.subr.bf16.mxu1 %v1988_v3 }
 0x672   : > { %1277 = vmatpush1.bf16.msra.mxu0 %v2185_v23  ;;  %1813 = vmatpush3.bf16.msra.mxu1 %v2212_v28 }
 0x728   : > { %v1183_v12 = vpop.f32.mrb[24].mxu0  ;;  %v1224_v13 = vpop.f32.mrb[24].mxu1 }
 0x729   : > { %v1230_v14 = vadd.f32 %v1570_v11, %v1183_v12  ;;  %v1185_v16 = vpop.f32.mrb[25].mxu0  ;;  %v1796_v17 = vpop.f32.mrb[25].mxu1  ;;  %v1244_v60 = vadd.f32 %v2257_v46, %v1224_v13 }
 0x72a   : > { %v1187_v18 = vpop.f32.mrb[26].mxu0  ;;  %v1227_v19 = vpop.f32.mrb[26].mxu1  ;;  %v1237_v22 = vadd.f32 %v1571_v15, %v1185_v16 }
 0x72b   : > { %v1573_v20 = vmul.f32 -1.442695, %v1230_v14  ;;  %v1188_v21 = vpop.f32.mrb[27].mxu0  ;;  %v1797_v25 = vpop.f32.mrb[27].mxu1 }
 0x72c   : > { %v1574_v3 = vmul.f32 -1.442695, %v1237_v22 }
 0x72d   : > { %1938 = vpow2.f32 %v1573_v20 }
 0x72e   : > { %1940 = vpow2.f32 %v1574_v3 }
 0x737   : > { %v1939_v23 = vpop.eup %1938 }
 0x738   : > { %v1234_v27 = vadd.f32 1.0, %v1939_v23  ;;  %v1941_v28 = vpop.eup %1940 }
 0x739   : > { %v1241_v59 = vadd.f32 1.0, %v1941_v28 }
 0x73a   : > { %1942 = vrcp.f32 %v1234_v27 }
 0x73b   : > { %1944 = vrcp.f32 %v1241_v59 }
 0x744   : > { %v1943_v61 = vpop.eup %1942 }
 0x745   : > { %v1245_v63 = vmul.f32 %v1943_v61, %v1244_v60  ;;  %v1945_v24 = vpop.eup %1944 }
 0x746   : > { %v1248_v26 = vsub.f32 1.0, %v1945_v24  ;;  %v1250_v2 = vmul.f32 %v1945_v24, %v2487_v53 }
 0x747   : > { %v1246_v0 = vadd.f32 %v1572_v62, %v1245_v63 }
 0x749   : > { %1946 = vtanh.f32 %v1246_v0 }
 0x753   : > { %v1947_v29 = vpop.eup %1946 }
 0x754   : > { %v1249_v30 = vmul.f32 %v1947_v29, %v1248_v26 }
 0x756   : > { %v1251_v5 = vadd.f32 %v1250_v2, %v1249_v30 }
 0x758   : > { %v1253_v6 = vpack.c.bf16 %v1251_v5, %v1251_v5 }
 0x75a   : > { %1575 = vst [vmem:[%s2045_s27 + $0x18] sm:$0xf] %v1253_v6  ;;  %1295 = vmatmul.mubr.bf16.vlgmr.msra.gmra.mrb[28].mxu0 %v1253_v6  ;;  %1815 = vmatmul.mubr.bf16.vlgmr.msra.gmra.mrb[28].mxu1 %v1253_v6 }
 0x82d   : > { %v1296_v8 = vpop.f32.mrb[28].mxu0  ;;  %v1337_v9 = vpop.f32.mrb[28].mxu1 }
 0x82e   : > { %v1343_v31 = vadd.f32 %v1576_v7, %v1296_v8  ;;  %v1298_v33 = vpop.f32.mrb[29].mxu0  ;;  %v1816_v34 = vpop.f32.mrb[29].mxu1  ;;  %v1357_v45 = vadd.f32 %v2257_v46, %v1337_v9 }
 0x82f   : > { %v1300_v35 = vpop.f32.mrb[30].mxu0  ;;  %v1340_v36 = vpop.f32.mrb[30].mxu1  ;;  %v1350_v39 = vadd.f32 %v1577_v32, %v1298_v33 }
 0x830   : > { %v1579_v37 = vmul.f32 -1.442695, %v1343_v31  ;;  %v1301_v38 = vpop.f32.mrb[31].mxu0  ;;  %v1817_v1 = vpop.f32.mrb[31].mxu1 }
 0x831   : > { %v1580_v40 = vmul.f32 -1.442695, %v1350_v39 }
 0x832   : > { %1948 = vpow2.f32 %v1579_v37 }
 0x833   : > { %1950 = vpow2.f32 %v1580_v40 }
 0x83c   : > { %v1949_v41 = vpop.eup %1948 }
 0x83d   : > { %v1347_v42 = vadd.f32 1.0, %v1949_v41  ;;  %v1951_v43 = vpop.eup %1950 }
 0x83e   : > { %v1354_v44 = vadd.f32 1.0, %v1951_v43 }
 0x83f   : > { %1952 = vrcp.f32 %v1347_v42 }
 0x840   : > { %1954 = vrcp.f32 %v1354_v44 }
 0x849   : > { %v1953_v47 = vpop.eup %1952 }
 0x84a   : > { %v1358_v49 = vmul.f32 %v1953_v47, %v1357_v45  ;;  %v1955_v51 = vpop.eup %1954 }
 0x84b   : > { %v1361_v52 = vsub.f32 1.0, %v1955_v51  ;;  %v1363_v55 = vmul.f32 %v1955_v51, %v1251_v5 }
 0x84c   : > { %v1359_v50 = vadd.f32 %v1578_v48, %v1358_v49 }
 0x84e   : > { %1956 = vtanh.f32 %v1359_v50 }
 0x858   : > { %v1957_v53 = vpop.eup %1956 }
 0x859   : > { %v1362_v54 = vmul.f32 %v1957_v53, %v1361_v52  ;;  %1372 = sbr.rel (%p1582_p6) target bundleno = 2150 (0x866), region = 44 }
 0x85b   : > { %v1364_v56 = vadd.f32 %v1363_v55, %v1362_v54 }
 0x85d   : > { %1365 = vst [vmem:[#allocation2] sm:$0xff] %v1364_v56  ;;  %v1366_v57 = vpack.c.bf16 %v1364_v56, %v1364_v56 }
 0x85f   : > { %1581 = vst [vmem:[%s2045_s27 + $0x1c] sm:$0xf] %v1366_v57 }
 0x864   : > { %v1373_v10 = vld [vmem:[#allocation2] sm:$0xff] }
 0x865   : > { %1374 = vst [vmem:[%s2566_s5] sm:$0xff] %v1373_v10 }
 0x866 PF: > { %s16_s20 = sadd.s32 1, %s1986_s20   ;;  %s2567_s18 = smov %s1982_s19 }
 0x867   : > { %p13_p7 = scmp.ge.s32.totalorder %s16_s20, 4   ;;  %s2568_s19 = smov %s2570_s21 }
 0x869   :  { %15 = sbr.rel (!%p13_p7) target bundleno = 2 (0x2), region = 103 }

</bundles_post_ra>
